<compile_context>
chip_gen: v6e
topology: v6e:2x2x1
jax: 0.10.0
libtpu: 0.0.40
codegen_flags: <defaults>
</compile_context>

<pallas_src>
import math
import functools

import jax
import jax.numpy as jnp
from jax.experimental import pallas as pl
from jax.experimental.pallas import tpu as pltpu


def _mha_kernel(q_ref, k_ref, v_ref,
                wq_ref, bq_ref, wk_ref, bk_ref, wv_ref, bv_ref,
                wo_ref, bo_ref, o_ref, *, num_heads: int, d_k: int):
    """One (batch, query-tile) step.

    q_ref / o_ref : (1, TQ, D) block of the current batch element.
    k_ref / v_ref : (1, S,  D) block (full sequence, grid-invariant over tiles).
    w*_ref        : (D, D) bf16 weights already transposed to [in, out];
                    W_q / b_q also carry the folded 1/sqrt(d_k) scale.
    b*_ref        : (1, D) f32 biases.
    """
    TQ = q_ref.shape[1]
    D = q_ref.shape[2]
    f32 = jnp.float32
    bf16 = jnp.bfloat16

    # bf16 MXU operands, f32 accumulation.
    q = q_ref[0].astype(bf16)            # (TQ, D)
    k = k_ref[0].astype(bf16)            # (S,  D)
    v = v_ref[0].astype(bf16)            # (S,  D)

    wq = wq_ref[...]
    wk = wk_ref[...]
    wv = wv_ref[...]
    wo = wo_ref[...]
    bq = bq_ref[...]
    bk = bk_ref[...]
    bv = bv_ref[...]
    bo = bo_ref[...]

    # Projections (f32 accumulate), re-cast once for the attention matmuls.
    # TODO(synk): when query is key is value (pure self-attention), these three
    #             matmuls could be fused into a single (S, D) @ (D, 3D) matmul.
    Q = (jnp.dot(q, wq, preferred_element_type=f32) + bq).astype(bf16)   # (TQ, D), pre-scaled
    K = (jnp.dot(k, wk, preferred_element_type=f32) + bk).astype(bf16)   # (S,  D)
    V = (jnp.dot(v, wv, preferred_element_type=f32) + bv).astype(bf16)   # (S,  D)

    # Per-head attention, accumulated directly into the (TQ, D) output through
    # the matching rows of W_o: no concat, each head's intermediates are
    # consumed immediately.
    out_acc = jnp.zeros((TQ, D), dtype=f32)
    for h in range(num_heads):
        lo = h * d_k
        Qh = Q[:, lo:lo + d_k]           # (TQ, d_k) bf16
        Kh = K[:, lo:lo + d_k]           # (S,  d_k) bf16
        Vh = V[:, lo:lo + d_k]           # (S,  d_k) bf16

        # scores = (Q / sqrt(d_k)) @ K^T  -- scale already folded into W_q/b_q.
        scores = jax.lax.dot_general(
            Qh, Kh, (((1,), (1,)), ((), ())),
            preferred_element_type=f32)                               # (TQ, S)

        # f32 softmax; normalization deferred to after the p@V matmul.
        m = jnp.max(scores, axis=-1, keepdims=True)
        p = jnp.exp(scores - m)
        l = jnp.sum(p, axis=-1, keepdims=True)                        # (TQ, 1)

        ctx = jnp.dot(p.astype(bf16), Vh, preferred_element_type=f32)  # (TQ, d_k)
        ctx = ctx * pl.reciprocal(l, approx=True)

        out_acc = out_acc + jnp.dot(
            ctx.astype(bf16), wo[lo:lo + d_k, :],
            preferred_element_type=f32)                               # (TQ, D)

    o_ref[0] = (out_acc + bo).astype(o_ref.dtype)


def prepare_params(params, *, num_heads: int):
    """One-time host-side prep: transpose to [in, out], fold the 1/sqrt(d_k)
    score scale into W_q / b_q, and cast weights to bf16 (keeps biases f32)."""
    D = params["w_q"].shape[0]
    d_k = D // num_heads
    scale = 1.0 / math.sqrt(d_k)
    return dict(
        wq=(params["w_q"].T * scale).astype(jnp.bfloat16),
        bq=(params["b_q"] * scale).reshape(1, D).astype(jnp.float32),
        wk=params["w_k"].T.astype(jnp.bfloat16),
        bk=params["b_k"].reshape(1, D).astype(jnp.float32),
        wv=params["w_v"].T.astype(jnp.bfloat16),
        bv=params["b_v"].reshape(1, D).astype(jnp.float32),
        wo=params["w_o"].T.astype(jnp.bfloat16),
        bo=params["b_o"].reshape(1, D).astype(jnp.float32),
    )


def _choose_query_tile(S: int) -> int:
    for cand in (512, 256, 128):
        if S % cand == 0:
            return cand
    return S  # short sequences: one tile


def multi_head_attention(query, key, value, prepared, *, num_heads: int):
    """query/key/value: [B, S, D] float32.  prepared: output of prepare_params."""
    B, S, D = query.shape
    assert D % num_heads == 0
    d_k = D // num_heads
    TQ = _choose_query_tile(S)
    QT = S // TQ

    q_spec = pl.BlockSpec((1, TQ, D), lambda b, t: (b, t, 0))
    kv_spec = pl.BlockSpec((1, S, D), lambda b, t: (b, 0, 0))   # invariant over t -> no re-DMA
    w_spec = pl.BlockSpec((D, D), lambda b, t: (0, 0))
    bias_spec = pl.BlockSpec((1, D), lambda b, t: (0, 0))
    o_spec = pl.BlockSpec((1, TQ, D), lambda b, t: (b, t, 0))

    kernel = functools.partial(_mha_kernel, num_heads=num_heads, d_k=d_k)

    # Advisory cost estimate for XLA's scheduler.
    flops = int(B * QT * (2 * TQ * D * D            # Q projection
                          + 4 * S * D * D           # K and V projections
                          + num_heads * (4 * TQ * S * d_k + 2 * TQ * d_k * D)))
    transcendentals = int(B * QT * num_heads * TQ * S)
    bytes_accessed = int(
        4 * (B * S * D) * 2                          # q in, out
        + 4 * (B * S * D) * 2                        # k, v in
        + 2 * 4 * D * D + 4 * 4 * D)                 # bf16 weights + f32 biases

    return pl.pallas_call(
        kernel,
        out_shape=jax.ShapeDtypeStruct((B, S, D), query.dtype),
        grid_spec=pltpu.PrefetchScalarGridSpec(
            num_scalar_prefetch=0,
            grid=(B, QT),
            in_specs=[q_spec, kv_spec, kv_spec,
                      w_spec, bias_spec, w_spec, bias_spec,
                      w_spec, bias_spec, w_spec, bias_spec],
            out_specs=o_spec,
        ),
        compiler_params=pltpu.CompilerParams(
            dimension_semantics=("parallel", "parallel")),
        cost_estimate=pl.CostEstimate(
            flops=flops,
            transcendentals=transcendentals,
            bytes_accessed=bytes_accessed),
    )(query, key, value,
      prepared["wq"], prepared["bq"], prepared["wk"], prepared["bk"],
      prepared["wv"], prepared["bv"], prepared["wo"], prepared["bo"])


def _reference_mha(query, key, value, params, *, num_heads: int):
    """Pure-JAX f32 reference mirroring the PyTorch forward (eval mode)."""
    B, S, D = query.shape
    d_k = D // num_heads

    def lin(x, w, b):
        return jnp.einsum("bsd,od->bso", x, w) + b

    Q = lin(query, params["w_q"], params["b_q"]).reshape(B, S, num_heads, d_k).transpose(0, 2, 1, 3)
    K = lin(key, params["w_k"], params["b_k"]).reshape(B, S, num_heads, d_k).transpose(0, 2, 1, 3)
    V = lin(value, params["w_v"], params["b_v"]).reshape(B, S, num_heads, d_k).transpose(0, 2, 1, 3)

    scores = jnp.einsum("bhqd,bhkd->bhqk", Q, K) / math.sqrt(d_k)
    attn = jax.nn.softmax(scores, axis=-1)
    ctx = jnp.einsum("bhqk,bhkd->bhqd", attn, V)
    ctx = ctx.transpose(0, 2, 1, 3).reshape(B, S, D)
    return lin(ctx, params["w_o"], params["b_o"])


def _init_params(key, d_model):
    """Deterministic PyTorch-nn.Linear-style init (uniform +-1/sqrt(fan_in))."""
    bound = 1.0 / math.sqrt(d_model)
    names = ["w_q", "b_q", "w_k", "b_k", "w_v", "b_v", "w_o", "b_o"]
    keys = jax.random.split(key, len(names))
    params = {}
    for name, k in zip(names, keys):
        shape = (d_model, d_model) if name.startswith("w") else (d_model,)
        params[name] = jax.random.uniform(
            k, shape, dtype=jnp.float32, minval=-bound, maxval=bound)
    return params


if __name__ == "__main__":
    B, S, D, H = 2, 8, 32, 8

    root = jax.random.PRNGKey(0)
    kq, kk, kv, kp = jax.random.split(root, 4)
    query = jax.random.normal(kq, (B, S, D), dtype=jnp.float32)
    key_in = jax.random.normal(kk, (B, S, D), dtype=jnp.float32)
    value = jax.random.normal(kv, (B, S, D), dtype=jnp.float32)
    params = _init_params(kp, D)

    prepared = prepare_params(params, num_heads=H)
    out = multi_head_attention(query, key_in, value, prepared, num_heads=H)
    out = jax.block_until_ready(out)

    ref = _reference_mha(query, key_in, value, params, num_heads=H)
    assert out.shape == (B, S, D)
    # Kernel uses bf16 MXU operands (f32 accumulation) + approx reciprocal, so
    # the tolerance vs. the f32 reference is widened accordingly.
    assert jnp.allclose(out, ref, atol=5e-2, rtol=5e-2), (
        f"max abs err = {jnp.max(jnp.abs(out - ref))}")

    print("KERNEL_OK")
</pallas_src>

<mosaic_0001>
module attributes {stable_mosaic.version = 11 : i64} {
  func.func @_mha_kernel(%arg0: i32, %arg1: i32, %arg2: memref<1x8x32xf32, #tpu.memory_space<vmem>>, %arg3: memref<1x8x32xf32, #tpu.memory_space<vmem>>, %arg4: memref<1x8x32xf32, #tpu.memory_space<vmem>>, %arg5: memref<32x32xbf16, #tpu.memory_space<vmem>>, %arg6: memref<1x32xf32, #tpu.memory_space<vmem>>, %arg7: memref<32x32xbf16, #tpu.memory_space<vmem>>, %arg8: memref<1x32xf32, #tpu.memory_space<vmem>>, %arg9: memref<32x32xbf16, #tpu.memory_space<vmem>>, %arg10: memref<1x32xf32, #tpu.memory_space<vmem>>, %arg11: memref<32x32xbf16, #tpu.memory_space<vmem>>, %arg12: memref<1x32xf32, #tpu.memory_space<vmem>>, %arg13: memref<1x8x32xf32, #tpu.memory_space<vmem>>) attributes {dimension_semantics = [#tpu.dimension_semantics<parallel>, #tpu.dimension_semantics<parallel>], iteration_bounds = array<i64: 2, 1>, scalar_prefetch = 0 : i64, scratch_operands = 0 : i64, tpu.core_type = #tpu.core_type<tc>, window_params = [{transform_indices = @transform_0, window_bounds = array<i64: 1, 8, 32>}, {transform_indices = @transform_1, window_bounds = array<i64: 1, 8, 32>}, {transform_indices = @transform_2, window_bounds = array<i64: 1, 8, 32>}, {pipeline_mode = #tpu.pipeline_mode<synchronous>, transform_indices = @transform_3, window_bounds = array<i64: 32, 32>}, {pipeline_mode = #tpu.pipeline_mode<synchronous>, transform_indices = @transform_4, window_bounds = array<i64: 1, 32>}, {pipeline_mode = #tpu.pipeline_mode<synchronous>, transform_indices = @transform_5, window_bounds = array<i64: 32, 32>}, {pipeline_mode = #tpu.pipeline_mode<synchronous>, transform_indices = @transform_6, window_bounds = array<i64: 1, 32>}, {pipeline_mode = #tpu.pipeline_mode<synchronous>, transform_indices = @transform_7, window_bounds = array<i64: 32, 32>}, {pipeline_mode = #tpu.pipeline_mode<synchronous>, transform_indices = @transform_8, window_bounds = array<i64: 1, 32>}, {pipeline_mode = #tpu.pipeline_mode<synchronous>, transform_indices = @transform_9, window_bounds = array<i64: 32, 32>}, {pipeline_mode = #tpu.pipeline_mode<synchronous>, transform_indices = @transform_10, window_bounds = array<i64: 1, 32>}, {transform_indices = @transform_11, window_bounds = array<i64: 1, 8, 32>}]} {
    %c0 = arith.constant 0 : index
    %c0_0 = arith.constant 0 : index
    %c0_1 = arith.constant 0 : index
    %0 = vector.load %arg2[%c0, %c0_0, %c0_1] : memref<1x8x32xf32, #tpu.memory_space<vmem>>, vector<1x8x32xf32>
    %1 = vector.shape_cast %0 : vector<1x8x32xf32> to vector<8x32xf32>
    %2 = arith.truncf %1 : vector<8x32xf32> to vector<8x32xbf16>
    %c0_2 = arith.constant 0 : index
    %c0_3 = arith.constant 0 : index
    %c0_4 = arith.constant 0 : index
    %3 = vector.load %arg3[%c0_2, %c0_3, %c0_4] : memref<1x8x32xf32, #tpu.memory_space<vmem>>, vector<1x8x32xf32>
    %4 = vector.shape_cast %3 : vector<1x8x32xf32> to vector<8x32xf32>
    %5 = arith.truncf %4 : vector<8x32xf32> to vector<8x32xbf16>
    %c0_5 = arith.constant 0 : index
    %c0_6 = arith.constant 0 : index
    %c0_7 = arith.constant 0 : index
    %6 = vector.load %arg4[%c0_5, %c0_6, %c0_7] : memref<1x8x32xf32, #tpu.memory_space<vmem>>, vector<1x8x32xf32>
    %7 = vector.shape_cast %6 : vector<1x8x32xf32> to vector<8x32xf32>
    %8 = arith.truncf %7 : vector<8x32xf32> to vector<8x32xbf16>
    %c0_8 = arith.constant 0 : index
    %c0_9 = arith.constant 0 : index
    %9 = vector.load %arg5[%c0_8, %c0_9] : memref<32x32xbf16, #tpu.memory_space<vmem>>, vector<32x32xbf16>
    %c0_10 = arith.constant 0 : index
    %c0_11 = arith.constant 0 : index
    %10 = vector.load %arg7[%c0_10, %c0_11] : memref<32x32xbf16, #tpu.memory_space<vmem>>, vector<32x32xbf16>
    %c0_12 = arith.constant 0 : index
    %c0_13 = arith.constant 0 : index
    %11 = vector.load %arg9[%c0_12, %c0_13] : memref<32x32xbf16, #tpu.memory_space<vmem>>, vector<32x32xbf16>
    %c0_14 = arith.constant 0 : index
    %c0_15 = arith.constant 0 : index
    %12 = vector.load %arg11[%c0_14, %c0_15] : memref<32x32xbf16, #tpu.memory_space<vmem>>, vector<32x32xbf16>
    %c0_16 = arith.constant 0 : index
    %c0_17 = arith.constant 0 : index
    %13 = vector.load %arg6[%c0_16, %c0_17] : memref<1x32xf32, #tpu.memory_space<vmem>>, vector<1x32xf32>
    %c0_18 = arith.constant 0 : index
    %c0_19 = arith.constant 0 : index
    %14 = vector.load %arg8[%c0_18, %c0_19] : memref<1x32xf32, #tpu.memory_space<vmem>>, vector<1x32xf32>
    %c0_20 = arith.constant 0 : index
    %c0_21 = arith.constant 0 : index
    %15 = vector.load %arg10[%c0_20, %c0_21] : memref<1x32xf32, #tpu.memory_space<vmem>>, vector<1x32xf32>
    %c0_22 = arith.constant 0 : index
    %c0_23 = arith.constant 0 : index
    %16 = vector.load %arg12[%c0_22, %c0_23] : memref<1x32xf32, #tpu.memory_space<vmem>>, vector<1x32xf32>
    %cst = arith.constant dense<0.000000e+00> : vector<8x32xf32>
    %17 = tpu.matmul %2, %9, %cst {dimension_numbers = #tpu.dot_dimension_numbers<[1], [0], [0], [1], [0, 0, 1, 1], [], []>} : vector<8x32xbf16>, vector<32x32xbf16>, vector<8x32xf32> -> vector<8x32xf32>
    %18 = vector.broadcast %13 : vector<1x32xf32> to vector<8x32xf32>
    %19 = arith.addf %17, %18 : vector<8x32xf32>
    %20 = arith.truncf %19 : vector<8x32xf32> to vector<8x32xbf16>
    %cst_24 = arith.constant dense<0.000000e+00> : vector<8x32xf32>
    %21 = tpu.matmul %5, %10, %cst_24 {dimension_numbers = #tpu.dot_dimension_numbers<[1], [0], [0], [1], [0, 0, 1, 1], [], []>} : vector<8x32xbf16>, vector<32x32xbf16>, vector<8x32xf32> -> vector<8x32xf32>
    %22 = vector.broadcast %14 : vector<1x32xf32> to vector<8x32xf32>
    %23 = arith.addf %21, %22 : vector<8x32xf32>
    %24 = arith.truncf %23 : vector<8x32xf32> to vector<8x32xbf16>
    %cst_25 = arith.constant dense<0.000000e+00> : vector<8x32xf32>
    %25 = tpu.matmul %8, %11, %cst_25 {dimension_numbers = #tpu.dot_dimension_numbers<[1], [0], [0], [1], [0, 0, 1, 1], [], []>} : vector<8x32xbf16>, vector<32x32xbf16>, vector<8x32xf32> -> vector<8x32xf32>
    %26 = vector.broadcast %15 : vector<1x32xf32> to vector<8x32xf32>
    %27 = arith.addf %25, %26 : vector<8x32xf32>
    %28 = arith.truncf %27 : vector<8x32xf32> to vector<8x32xbf16>
    %cst_26 = arith.constant 0.000000e+00 : f32
    %29 = vector.broadcast %cst_26 : f32 to vector<8x32xf32>
    %30 = vector.extract_strided_slice %20 {offsets = [0, 0], sizes = [8, 4], strides = [1, 1]} : vector<8x32xbf16> to vector<8x4xbf16>
    %31 = vector.extract_strided_slice %24 {offsets = [0, 0], sizes = [8, 4], strides = [1, 1]} : vector<8x32xbf16> to vector<8x4xbf16>
    %32 = vector.extract_strided_slice %28 {offsets = [0, 0], sizes = [8, 4], strides = [1, 1]} : vector<8x32xbf16> to vector<8x4xbf16>
    %cst_27 = arith.constant dense<0.000000e+00> : vector<8x8xf32>
    %33 = tpu.matmul %30, %31, %cst_27 {dimension_numbers = #tpu.dot_dimension_numbers<[1], [1], [0], [0], [0, 0, 1, 0], [], []>} : vector<8x4xbf16>, vector<8x4xbf16>, vector<8x8xf32> -> vector<8x8xf32>
    %cst_28 = arith.constant dense<0xFF800000> : vector<8xf32>
    %34 = vector.multi_reduction <maximumf>, %33, %cst_28 [1] : vector<8x8xf32> to vector<8xf32>
    %35 = vector.shape_cast %34 : vector<8xf32> to vector<8x1xf32>
    %36 = vector.broadcast %35 : vector<8x1xf32> to vector<8x8xf32>
    %37 = arith.subf %33, %36 : vector<8x8xf32>
    %38 = math.exp %37 : vector<8x8xf32>
    %cst_29 = arith.constant dense<0.000000e+00> : vector<8xf32>
    %39 = vector.multi_reduction <add>, %38, %cst_29 [1] : vector<8x8xf32> to vector<8xf32>
    %40 = vector.shape_cast %39 : vector<8xf32> to vector<8x1xf32>
    %41 = arith.truncf %38 : vector<8x8xf32> to vector<8x8xbf16>
    %cst_30 = arith.constant dense<0.000000e+00> : vector<8x4xf32>
    %42 = tpu.matmul %41, %32, %cst_30 {dimension_numbers = #tpu.dot_dimension_numbers<[1], [0], [0], [1], [0, 0, 1, 1], [], []>} : vector<8x8xbf16>, vector<8x4xbf16>, vector<8x4xf32> -> vector<8x4xf32>
    %43 = tpu.reciprocal %40 {approx = true} : vector<8x1xf32> -> vector<8x1xf32>
    %44 = vector.broadcast %43 : vector<8x1xf32> to vector<8x4xf32>
    %45 = arith.mulf %42, %44 : vector<8x4xf32>
    %46 = arith.truncf %45 : vector<8x4xf32> to vector<8x4xbf16>
    %47 = vector.extract_strided_slice %12 {offsets = [0, 0], sizes = [4, 32], strides = [1, 1]} : vector<32x32xbf16> to vector<4x32xbf16>
    %cst_31 = arith.constant dense<0.000000e+00> : vector<8x32xf32>
    %48 = tpu.matmul %46, %47, %cst_31 {dimension_numbers = #tpu.dot_dimension_numbers<[1], [0], [0], [1], [0, 0, 1, 1], [], []>} : vector<8x4xbf16>, vector<4x32xbf16>, vector<8x32xf32> -> vector<8x32xf32>
    %49 = arith.addf %29, %48 : vector<8x32xf32>
    %50 = vector.extract_strided_slice %20 {offsets = [0, 4], sizes = [8, 4], strides = [1, 1]} : vector<8x32xbf16> to vector<8x4xbf16>
    %51 = vector.extract_strided_slice %24 {offsets = [0, 4], sizes = [8, 4], strides = [1, 1]} : vector<8x32xbf16> to vector<8x4xbf16>
    %52 = vector.extract_strided_slice %28 {offsets = [0, 4], sizes = [8, 4], strides = [1, 1]} : vector<8x32xbf16> to vector<8x4xbf16>
    %cst_32 = arith.constant dense<0.000000e+00> : vector<8x8xf32>
    %53 = tpu.matmul %50, %51, %cst_32 {dimension_numbers = #tpu.dot_dimension_numbers<[1], [1], [0], [0], [0, 0, 1, 0], [], []>} : vector<8x4xbf16>, vector<8x4xbf16>, vector<8x8xf32> -> vector<8x8xf32>
    %cst_33 = arith.constant dense<0xFF800000> : vector<8xf32>
    %54 = vector.multi_reduction <maximumf>, %53, %cst_33 [1] : vector<8x8xf32> to vector<8xf32>
    %55 = vector.shape_cast %54 : vector<8xf32> to vector<8x1xf32>
    %56 = vector.broadcast %55 : vector<8x1xf32> to vector<8x8xf32>
    %57 = arith.subf %53, %56 : vector<8x8xf32>
    %58 = math.exp %57 : vector<8x8xf32>
    %cst_34 = arith.constant dense<0.000000e+00> : vector<8xf32>
    %59 = vector.multi_reduction <add>, %58, %cst_34 [1] : vector<8x8xf32> to vector<8xf32>
    %60 = vector.shape_cast %59 : vector<8xf32> to vector<8x1xf32>
    %61 = arith.truncf %58 : vector<8x8xf32> to vector<8x8xbf16>
    %cst_35 = arith.constant dense<0.000000e+00> : vector<8x4xf32>
    %62 = tpu.matmul %61, %52, %cst_35 {dimension_numbers = #tpu.dot_dimension_numbers<[1], [0], [0], [1], [0, 0, 1, 1], [], []>} : vector<8x8xbf16>, vector<8x4xbf16>, vector<8x4xf32> -> vector<8x4xf32>
    %63 = tpu.reciprocal %60 {approx = true} : vector<8x1xf32> -> vector<8x1xf32>
    %64 = vector.broadcast %63 : vector<8x1xf32> to vector<8x4xf32>
    %65 = arith.mulf %62, %64 : vector<8x4xf32>
    %66 = arith.truncf %65 : vector<8x4xf32> to vector<8x4xbf16>
    %67 = vector.extract_strided_slice %12 {offsets = [4, 0], sizes = [4, 32], strides = [1, 1]} : vector<32x32xbf16> to vector<4x32xbf16>
    %cst_36 = arith.constant dense<0.000000e+00> : vector<8x32xf32>
    %68 = tpu.matmul %66, %67, %cst_36 {dimension_numbers = #tpu.dot_dimension_numbers<[1], [0], [0], [1], [0, 0, 1, 1], [], []>} : vector<8x4xbf16>, vector<4x32xbf16>, vector<8x32xf32> -> vector<8x32xf32>
    %69 = arith.addf %49, %68 : vector<8x32xf32>
    %70 = vector.extract_strided_slice %20 {offsets = [0, 8], sizes = [8, 4], strides = [1, 1]} : vector<8x32xbf16> to vector<8x4xbf16>
    %71 = vector.extract_strided_slice %24 {offsets = [0, 8], sizes = [8, 4], strides = [1, 1]} : vector<8x32xbf16> to vector<8x4xbf16>
    %72 = vector.extract_strided_slice %28 {offsets = [0, 8], sizes = [8, 4], strides = [1, 1]} : vector<8x32xbf16> to vector<8x4xbf16>
    %cst_37 = arith.constant dense<0.000000e+00> : vector<8x8xf32>
    %73 = tpu.matmul %70, %71, %cst_37 {dimension_numbers = #tpu.dot_dimension_numbers<[1], [1], [0], [0], [0, 0, 1, 0], [], []>} : vector<8x4xbf16>, vector<8x4xbf16>, vector<8x8xf32> -> vector<8x8xf32>
    %cst_38 = arith.constant dense<0xFF800000> : vector<8xf32>
    %74 = vector.multi_reduction <maximumf>, %73, %cst_38 [1] : vector<8x8xf32> to vector<8xf32>
    %75 = vector.shape_cast %74 : vector<8xf32> to vector<8x1xf32>
    %76 = vector.broadcast %75 : vector<8x1xf32> to vector<8x8xf32>
    %77 = arith.subf %73, %76 : vector<8x8xf32>
    %78 = math.exp %77 : vector<8x8xf32>
    %cst_39 = arith.constant dense<0.000000e+00> : vector<8xf32>
    %79 = vector.multi_reduction <add>, %78, %cst_39 [1] : vector<8x8xf32> to vector<8xf32>
    %80 = vector.shape_cast %79 : vector<8xf32> to vector<8x1xf32>
    %81 = arith.truncf %78 : vector<8x8xf32> to vector<8x8xbf16>
    %cst_40 = arith.constant dense<0.000000e+00> : vector<8x4xf32>
    %82 = tpu.matmul %81, %72, %cst_40 {dimension_numbers = #tpu.dot_dimension_numbers<[1], [0], [0], [1], [0, 0, 1, 1], [], []>} : vector<8x8xbf16>, vector<8x4xbf16>, vector<8x4xf32> -> vector<8x4xf32>
    %83 = tpu.reciprocal %80 {approx = true} : vector<8x1xf32> -> vector<8x1xf32>
    %84 = vector.broadcast %83 : vector<8x1xf32> to vector<8x4xf32>
    %85 = arith.mulf %82, %84 : vector<8x4xf32>
    %86 = arith.truncf %85 : vector<8x4xf32> to vector<8x4xbf16>
    %87 = vector.extract_strided_slice %12 {offsets = [8, 0], sizes = [4, 32], strides = [1, 1]} : vector<32x32xbf16> to vector<4x32xbf16>
    %cst_41 = arith.constant dense<0.000000e+00> : vector<8x32xf32>
    %88 = tpu.matmul %86, %87, %cst_41 {dimension_numbers = #tpu.dot_dimension_numbers<[1], [0], [0], [1], [0, 0, 1, 1], [], []>} : vector<8x4xbf16>, vector<4x32xbf16>, vector<8x32xf32> -> vector<8x32xf32>
    %89 = arith.addf %69, %88 : vector<8x32xf32>
    %90 = vector.extract_strided_slice %20 {offsets = [0, 12], sizes = [8, 4], strides = [1, 1]} : vector<8x32xbf16> to vector<8x4xbf16>
    %91 = vector.extract_strided_slice %24 {offsets = [0, 12], sizes = [8, 4], strides = [1, 1]} : vector<8x32xbf16> to vector<8x4xbf16>
    %92 = vector.extract_strided_slice %28 {offsets = [0, 12], sizes = [8, 4], strides = [1, 1]} : vector<8x32xbf16> to vector<8x4xbf16>
    %cst_42 = arith.constant dense<0.000000e+00> : vector<8x8xf32>
    %93 = tpu.matmul %90, %91, %cst_42 {dimension_numbers = #tpu.dot_dimension_numbers<[1], [1], [0], [0], [0, 0, 1, 0], [], []>} : vector<8x4xbf16>, vector<8x4xbf16>, vector<8x8xf32> -> vector<8x8xf32>
    %cst_43 = arith.constant dense<0xFF800000> : vector<8xf32>
    %94 = vector.multi_reduction <maximumf>, %93, %cst_43 [1] : vector<8x8xf32> to vector<8xf32>
    %95 = vector.shape_cast %94 : vector<8xf32> to vector<8x1xf32>
    %96 = vector.broadcast %95 : vector<8x1xf32> to vector<8x8xf32>
    %97 = arith.subf %93, %96 : vector<8x8xf32>
    %98 = math.exp %97 : vector<8x8xf32>
    %cst_44 = arith.constant dense<0.000000e+00> : vector<8xf32>
    %99 = vector.multi_reduction <add>, %98, %cst_44 [1] : vector<8x8xf32> to vector<8xf32>
    %100 = vector.shape_cast %99 : vector<8xf32> to vector<8x1xf32>
    %101 = arith.truncf %98 : vector<8x8xf32> to vector<8x8xbf16>
    %cst_45 = arith.constant dense<0.000000e+00> : vector<8x4xf32>
    %102 = tpu.matmul %101, %92, %cst_45 {dimension_numbers = #tpu.dot_dimension_numbers<[1], [0], [0], [1], [0, 0, 1, 1], [], []>} : vector<8x8xbf16>, vector<8x4xbf16>, vector<8x4xf32> -> vector<8x4xf32>
    %103 = tpu.reciprocal %100 {approx = true} : vector<8x1xf32> -> vector<8x1xf32>
    %104 = vector.broadcast %103 : vector<8x1xf32> to vector<8x4xf32>
    %105 = arith.mulf %102, %104 : vector<8x4xf32>
    %106 = arith.truncf %105 : vector<8x4xf32> to vector<8x4xbf16>
    %107 = vector.extract_strided_slice %12 {offsets = [12, 0], sizes = [4, 32], strides = [1, 1]} : vector<32x32xbf16> to vector<4x32xbf16>
    %cst_46 = arith.constant dense<0.000000e+00> : vector<8x32xf32>
    %108 = tpu.matmul %106, %107, %cst_46 {dimension_numbers = #tpu.dot_dimension_numbers<[1], [0], [0], [1], [0, 0, 1, 1], [], []>} : vector<8x4xbf16>, vector<4x32xbf16>, vector<8x32xf32> -> vector<8x32xf32>
    %109 = arith.addf %89, %108 : vector<8x32xf32>
    %110 = vector.extract_strided_slice %20 {offsets = [0, 16], sizes = [8, 4], strides = [1, 1]} : vector<8x32xbf16> to vector<8x4xbf16>
    %111 = vector.extract_strided_slice %24 {offsets = [0, 16], sizes = [8, 4], strides = [1, 1]} : vector<8x32xbf16> to vector<8x4xbf16>
    %112 = vector.extract_strided_slice %28 {offsets = [0, 16], sizes = [8, 4], strides = [1, 1]} : vector<8x32xbf16> to vector<8x4xbf16>
    %cst_47 = arith.constant dense<0.000000e+00> : vector<8x8xf32>
    %113 = tpu.matmul %110, %111, %cst_47 {dimension_numbers = #tpu.dot_dimension_numbers<[1], [1], [0], [0], [0, 0, 1, 0], [], []>} : vector<8x4xbf16>, vector<8x4xbf16>, vector<8x8xf32> -> vector<8x8xf32>
    %cst_48 = arith.constant dense<0xFF800000> : vector<8xf32>
    %114 = vector.multi_reduction <maximumf>, %113, %cst_48 [1] : vector<8x8xf32> to vector<8xf32>
    %115 = vector.shape_cast %114 : vector<8xf32> to vector<8x1xf32>
    %116 = vector.broadcast %115 : vector<8x1xf32> to vector<8x8xf32>
    %117 = arith.subf %113, %116 : vector<8x8xf32>
    %118 = math.exp %117 : vector<8x8xf32>
    %cst_49 = arith.constant dense<0.000000e+00> : vector<8xf32>
    %119 = vector.multi_reduction <add>, %118, %cst_49 [1] : vector<8x8xf32> to vector<8xf32>
    %120 = vector.shape_cast %119 : vector<8xf32> to vector<8x1xf32>
    %121 = arith.truncf %118 : vector<8x8xf32> to vector<8x8xbf16>
    %cst_50 = arith.constant dense<0.000000e+00> : vector<8x4xf32>
    %122 = tpu.matmul %121, %112, %cst_50 {dimension_numbers = #tpu.dot_dimension_numbers<[1], [0], [0], [1], [0, 0, 1, 1], [], []>} : vector<8x8xbf16>, vector<8x4xbf16>, vector<8x4xf32> -> vector<8x4xf32>
    %123 = tpu.reciprocal %120 {approx = true} : vector<8x1xf32> -> vector<8x1xf32>
    %124 = vector.broadcast %123 : vector<8x1xf32> to vector<8x4xf32>
    %125 = arith.mulf %122, %124 : vector<8x4xf32>
    %126 = arith.truncf %125 : vector<8x4xf32> to vector<8x4xbf16>
    %127 = vector.extract_strided_slice %12 {offsets = [16, 0], sizes = [4, 32], strides = [1, 1]} : vector<32x32xbf16> to vector<4x32xbf16>
    %cst_51 = arith.constant dense<0.000000e+00> : vector<8x32xf32>
    %128 = tpu.matmul %126, %127, %cst_51 {dimension_numbers = #tpu.dot_dimension_numbers<[1], [0], [0], [1], [0, 0, 1, 1], [], []>} : vector<8x4xbf16>, vector<4x32xbf16>, vector<8x32xf32> -> vector<8x32xf32>
    %129 = arith.addf %109, %128 : vector<8x32xf32>
    %130 = vector.extract_strided_slice %20 {offsets = [0, 20], sizes = [8, 4], strides = [1, 1]} : vector<8x32xbf16> to vector<8x4xbf16>
    %131 = vector.extract_strided_slice %24 {offsets = [0, 20], sizes = [8, 4], strides = [1, 1]} : vector<8x32xbf16> to vector<8x4xbf16>
    %132 = vector.extract_strided_slice %28 {offsets = [0, 20], sizes = [8, 4], strides = [1, 1]} : vector<8x32xbf16> to vector<8x4xbf16>
    %cst_52 = arith.constant dense<0.000000e+00> : vector<8x8xf32>
    %133 = tpu.matmul %130, %131, %cst_52 {dimension_numbers = #tpu.dot_dimension_numbers<[1], [1], [0], [0], [0, 0, 1, 0], [], []>} : vector<8x4xbf16>, vector<8x4xbf16>, vector<8x8xf32> -> vector<8x8xf32>
    %cst_53 = arith.constant dense<0xFF800000> : vector<8xf32>
    %134 = vector.multi_reduction <maximumf>, %133, %cst_53 [1] : vector<8x8xf32> to vector<8xf32>
    %135 = vector.shape_cast %134 : vector<8xf32> to vector<8x1xf32>
    %136 = vector.broadcast %135 : vector<8x1xf32> to vector<8x8xf32>
    %137 = arith.subf %133, %136 : vector<8x8xf32>
    %138 = math.exp %137 : vector<8x8xf32>
    %cst_54 = arith.constant dense<0.000000e+00> : vector<8xf32>
    %139 = vector.multi_reduction <add>, %138, %cst_54 [1] : vector<8x8xf32> to vector<8xf32>
    %140 = vector.shape_cast %139 : vector<8xf32> to vector<8x1xf32>
    %141 = arith.truncf %138 : vector<8x8xf32> to vector<8x8xbf16>
    %cst_55 = arith.constant dense<0.000000e+00> : vector<8x4xf32>
    %142 = tpu.matmul %141, %132, %cst_55 {dimension_numbers = #tpu.dot_dimension_numbers<[1], [0], [0], [1], [0, 0, 1, 1], [], []>} : vector<8x8xbf16>, vector<8x4xbf16>, vector<8x4xf32> -> vector<8x4xf32>
    %143 = tpu.reciprocal %140 {approx = true} : vector<8x1xf32> -> vector<8x1xf32>
    %144 = vector.broadcast %143 : vector<8x1xf32> to vector<8x4xf32>
    %145 = arith.mulf %142, %144 : vector<8x4xf32>
    %146 = arith.truncf %145 : vector<8x4xf32> to vector<8x4xbf16>
    %147 = vector.extract_strided_slice %12 {offsets = [20, 0], sizes = [4, 32], strides = [1, 1]} : vector<32x32xbf16> to vector<4x32xbf16>
    %cst_56 = arith.constant dense<0.000000e+00> : vector<8x32xf32>
    %148 = tpu.matmul %146, %147, %cst_56 {dimension_numbers = #tpu.dot_dimension_numbers<[1], [0], [0], [1], [0, 0, 1, 1], [], []>} : vector<8x4xbf16>, vector<4x32xbf16>, vector<8x32xf32> -> vector<8x32xf32>
    %149 = arith.addf %129, %148 : vector<8x32xf32>
    %150 = vector.extract_strided_slice %20 {offsets = [0, 24], sizes = [8, 4], strides = [1, 1]} : vector<8x32xbf16> to vector<8x4xbf16>
    %151 = vector.extract_strided_slice %24 {offsets = [0, 24], sizes = [8, 4], strides = [1, 1]} : vector<8x32xbf16> to vector<8x4xbf16>
    %152 = vector.extract_strided_slice %28 {offsets = [0, 24], sizes = [8, 4], strides = [1, 1]} : vector<8x32xbf16> to vector<8x4xbf16>
    %cst_57 = arith.constant dense<0.000000e+00> : vector<8x8xf32>
    %153 = tpu.matmul %150, %151, %cst_57 {dimension_numbers = #tpu.dot_dimension_numbers<[1], [1], [0], [0], [0, 0, 1, 0], [], []>} : vector<8x4xbf16>, vector<8x4xbf16>, vector<8x8xf32> -> vector<8x8xf32>
    %cst_58 = arith.constant dense<0xFF800000> : vector<8xf32>
    %154 = vector.multi_reduction <maximumf>, %153, %cst_58 [1] : vector<8x8xf32> to vector<8xf32>
    %155 = vector.shape_cast %154 : vector<8xf32> to vector<8x1xf32>
    %156 = vector.broadcast %155 : vector<8x1xf32> to vector<8x8xf32>
    %157 = arith.subf %153, %156 : vector<8x8xf32>
    %158 = math.exp %157 : vector<8x8xf32>
    %cst_59 = arith.constant dense<0.000000e+00> : vector<8xf32>
    %159 = vector.multi_reduction <add>, %158, %cst_59 [1] : vector<8x8xf32> to vector<8xf32>
    %160 = vector.shape_cast %159 : vector<8xf32> to vector<8x1xf32>
    %161 = arith.truncf %158 : vector<8x8xf32> to vector<8x8xbf16>
    %cst_60 = arith.constant dense<0.000000e+00> : vector<8x4xf32>
    %162 = tpu.matmul %161, %152, %cst_60 {dimension_numbers = #tpu.dot_dimension_numbers<[1], [0], [0], [1], [0, 0, 1, 1], [], []>} : vector<8x8xbf16>, vector<8x4xbf16>, vector<8x4xf32> -> vector<8x4xf32>
    %163 = tpu.reciprocal %160 {approx = true} : vector<8x1xf32> -> vector<8x1xf32>
    %164 = vector.broadcast %163 : vector<8x1xf32> to vector<8x4xf32>
    %165 = arith.mulf %162, %164 : vector<8x4xf32>
    %166 = arith.truncf %165 : vector<8x4xf32> to vector<8x4xbf16>
    %167 = vector.extract_strided_slice %12 {offsets = [24, 0], sizes = [4, 32], strides = [1, 1]} : vector<32x32xbf16> to vector<4x32xbf16>
    %cst_61 = arith.constant dense<0.000000e+00> : vector<8x32xf32>
    %168 = tpu.matmul %166, %167, %cst_61 {dimension_numbers = #tpu.dot_dimension_numbers<[1], [0], [0], [1], [0, 0, 1, 1], [], []>} : vector<8x4xbf16>, vector<4x32xbf16>, vector<8x32xf32> -> vector<8x32xf32>
    %169 = arith.addf %149, %168 : vector<8x32xf32>
    %170 = vector.extract_strided_slice %20 {offsets = [0, 28], sizes = [8, 4], strides = [1, 1]} : vector<8x32xbf16> to vector<8x4xbf16>
    %171 = vector.extract_strided_slice %24 {offsets = [0, 28], sizes = [8, 4], strides = [1, 1]} : vector<8x32xbf16> to vector<8x4xbf16>
    %172 = vector.extract_strided_slice %28 {offsets = [0, 28], sizes = [8, 4], strides = [1, 1]} : vector<8x32xbf16> to vector<8x4xbf16>
    %cst_62 = arith.constant dense<0.000000e+00> : vector<8x8xf32>
    %173 = tpu.matmul %170, %171, %cst_62 {dimension_numbers = #tpu.dot_dimension_numbers<[1], [1], [0], [0], [0, 0, 1, 0], [], []>} : vector<8x4xbf16>, vector<8x4xbf16>, vector<8x8xf32> -> vector<8x8xf32>
    %cst_63 = arith.constant dense<0xFF800000> : vector<8xf32>
    %174 = vector.multi_reduction <maximumf>, %173, %cst_63 [1] : vector<8x8xf32> to vector<8xf32>
    %175 = vector.shape_cast %174 : vector<8xf32> to vector<8x1xf32>
    %176 = vector.broadcast %175 : vector<8x1xf32> to vector<8x8xf32>
    %177 = arith.subf %173, %176 : vector<8x8xf32>
    %178 = math.exp %177 : vector<8x8xf32>
    %cst_64 = arith.constant dense<0.000000e+00> : vector<8xf32>
    %179 = vector.multi_reduction <add>, %178, %cst_64 [1] : vector<8x8xf32> to vector<8xf32>
    %180 = vector.shape_cast %179 : vector<8xf32> to vector<8x1xf32>
    %181 = arith.truncf %178 : vector<8x8xf32> to vector<8x8xbf16>
    %cst_65 = arith.constant dense<0.000000e+00> : vector<8x4xf32>
    %182 = tpu.matmul %181, %172, %cst_65 {dimension_numbers = #tpu.dot_dimension_numbers<[1], [0], [0], [1], [0, 0, 1, 1], [], []>} : vector<8x8xbf16>, vector<8x4xbf16>, vector<8x4xf32> -> vector<8x4xf32>
    %183 = tpu.reciprocal %180 {approx = true} : vector<8x1xf32> -> vector<8x1xf32>
    %184 = vector.broadcast %183 : vector<8x1xf32> to vector<8x4xf32>
    %185 = arith.mulf %182, %184 : vector<8x4xf32>
    %186 = arith.truncf %185 : vector<8x4xf32> to vector<8x4xbf16>
    %187 = vector.extract_strided_slice %12 {offsets = [28, 0], sizes = [4, 32], strides = [1, 1]} : vector<32x32xbf16> to vector<4x32xbf16>
    %cst_66 = arith.constant dense<0.000000e+00> : vector<8x32xf32>
    %188 = tpu.matmul %186, %187, %cst_66 {dimension_numbers = #tpu.dot_dimension_numbers<[1], [0], [0], [1], [0, 0, 1, 1], [], []>} : vector<8x4xbf16>, vector<4x32xbf16>, vector<8x32xf32> -> vector<8x32xf32>
    %189 = arith.addf %169, %188 : vector<8x32xf32>
    %190 = vector.broadcast %16 : vector<1x32xf32> to vector<8x32xf32>
    %191 = arith.addf %189, %190 : vector<8x32xf32>
    %c0_67 = arith.constant 0 : index
    %c0_68 = arith.constant 0 : index
    %c0_69 = arith.constant 0 : index
    %192 = vector.load %arg13[%c0_67, %c0_68, %c0_69] : memref<1x8x32xf32, #tpu.memory_space<vmem>>, vector<1x8x32xf32>
    %193 = vector.shape_cast %192 : vector<1x8x32xf32> to vector<8x32xf32>
    %194 = vector.shape_cast %191 : vector<8x32xf32> to vector<1x8x32xf32>
    tpu.vector_store %arg13[%c0_67, %c0_68, %c0_69], %194 {strides = array<i32>} : memref<1x8x32xf32, #tpu.memory_space<vmem>>, vector<1x8x32xf32>,
    return
  }
  func.func @transform_0(%arg0: i32, %arg1: i32) -> (i32, i32, i32) {
    %c0_i32 = arith.constant 0 : i32
    %c0_i32_0 = arith.constant 0 : i32
    return %arg0, %arg1, %c0_i32 : i32, i32, i32
  }
  func.func @transform_1(%arg0: i32, %arg1: i32) -> (i32, i32, i32) {
    %c0_i32 = arith.constant 0 : i32
    %c0_i32_0 = arith.constant 0 : i32
    %c0_i32_1 = arith.constant 0 : i32
    return %arg0, %c0_i32, %c0_i32_0 : i32, i32, i32
  }
  func.func @transform_2(%arg0: i32, %arg1: i32) -> (i32, i32, i32) {
    %c0_i32 = arith.constant 0 : i32
    %c0_i32_0 = arith.constant 0 : i32
    %c0_i32_1 = arith.constant 0 : i32
    return %arg0, %c0_i32, %c0_i32_0 : i32, i32, i32
  }
  func.func @transform_3(%arg0: i32, %arg1: i32) -> (i32, i32) {
    %c0_i32 = arith.constant 0 : i32
    %c0_i32_0 = arith.constant 0 : i32
    %c0_i32_1 = arith.constant 0 : i32
    return %c0_i32, %c0_i32_0 : i32, i32
  }
  func.func @transform_4(%arg0: i32, %arg1: i32) -> (i32, i32) {
    %c0_i32 = arith.constant 0 : i32
    %c0_i32_0 = arith.constant 0 : i32
    %c0_i32_1 = arith.constant 0 : i32
    return %c0_i32, %c0_i32_0 : i32, i32
  }
  func.func @transform_5(%arg0: i32, %arg1: i32) -> (i32, i32) {
    %c0_i32 = arith.constant 0 : i32
    %c0_i32_0 = arith.constant 0 : i32
    %c0_i32_1 = arith.constant 0 : i32
    return %c0_i32, %c0_i32_0 : i32, i32
  }
  func.func @transform_6(%arg0: i32, %arg1: i32) -> (i32, i32) {
    %c0_i32 = arith.constant 0 : i32
    %c0_i32_0 = arith.constant 0 : i32
    %c0_i32_1 = arith.constant 0 : i32
    return %c0_i32, %c0_i32_0 : i32, i32
  }
  func.func @transform_7(%arg0: i32, %arg1: i32) -> (i32, i32) {
    %c0_i32 = arith.constant 0 : i32
    %c0_i32_0 = arith.constant 0 : i32
    %c0_i32_1 = arith.constant 0 : i32
    return %c0_i32, %c0_i32_0 : i32, i32
  }
  func.func @transform_8(%arg0: i32, %arg1: i32) -> (i32, i32) {
    %c0_i32 = arith.constant 0 : i32
    %c0_i32_0 = arith.constant 0 : i32
    %c0_i32_1 = arith.constant 0 : i32
    return %c0_i32, %c0_i32_0 : i32, i32
  }
  func.func @transform_9(%arg0: i32, %arg1: i32) -> (i32, i32) {
    %c0_i32 = arith.constant 0 : i32
    %c0_i32_0 = arith.constant 0 : i32
    %c0_i32_1 = arith.constant 0 : i32
    return %c0_i32, %c0_i32_0 : i32, i32
  }
  func.func @transform_10(%arg0: i32, %arg1: i32) -> (i32, i32) {
    %c0_i32 = arith.constant 0 : i32
    %c0_i32_0 = arith.constant 0 : i32
    %c0_i32_1 = arith.constant 0 : i32
    return %c0_i32, %c0_i32_0 : i32, i32
  }
  func.func @transform_11(%arg0: i32, %arg1: i32) -> (i32, i32, i32) {
    %c0_i32 = arith.constant 0 : i32
    %c0_i32_0 = arith.constant 0 : i32
    return %arg0, %arg1, %c0_i32 : i32, i32, i32
  }
}

</mosaic_0001>

<bundles_post_ra>
// kernel: tpu_custom_call.1
= control target key start
LH: loop header
LB: loop body
LE: loop exit
PB: predicated region body
PF: predicated region fallthrough
CT: control target
= control target key end

     0   :  { %s3668_s0 = inlined_call_operand.hbm [shape: f32[2,8,32], index: 0, kind: input, shape index: {}]   ;;  %s3669_s1 = inlined_call_operand.hbm [shape: f32[2,8,32], index: 1, kind: input, shape index: {}]   ;;  %s3670_s2 = inlined_call_operand.hbm [shape: f32[2,8,32], index: 2, kind: input, shape index: {}]   ;;  %s3671_s3 = inlined_call_operand.hbm [shape: bf16[32,32], index: 3, kind: input, shape index: {}]   ;;  %s3672_s4 = inlined_call_operand.hbm [shape: f32[1,32], index: 4, kind: input, shape index: {}]   ;;  %s3673_s5 = inlined_call_operand.hbm [shape: bf16[32,32], index: 5, kind: input, shape index: {}]   ;;  %s3674_s6 = inlined_call_operand.hbm [shape: f32[1,32], index: 6, kind: input, shape index: {}]   ;;  %s3675_s7 = inlined_call_operand.hbm [shape: bf16[32,32], index: 7, kind: input, shape index: {}]   ;;  %s3676_s8 = inlined_call_operand.hbm [shape: f32[1,32], index: 8, kind: input, shape index: {}]   ;;  %s3677_s9 = inlined_call_operand.vmem [shape: bf16[32,32], index: 9, kind: input, shape index: {}]   ;;  %s3678_s10 = inlined_call_operand.vmem [shape: f32[1,32], index: 10, kind: input, shape index: {}]   ;;  %s3679_s11 = inlined_call_operand.hbm [shape: f32[2,8,32], index: 11, kind: output, shape index: {}]  }
   0x1   :  { %3697 = sst [smem:[#allocation31_spill]] %s3671_s3 }
   0x2   :  { %3698 = sst [smem:[#allocation32_spill]] %s3673_s5 }
   0x3   :  { %3699 = sst [smem:[#allocation33_spill]] %s3675_s7 }
   0x4   :  { %3700 = sst [smem:[#allocation34_spill]] %s3679_s11 }
   0x5   :  { %16 = vsyncpa [#allocation3], 0 }
   0x6   :  { %18 = vsyncpa [#allocation3 + $0x1], 0 }
   0x7   :  { %19 = vsyncpa [#allocation6], 0 }
   0x8   :  { %21 = vsyncpa [#allocation6 + $0x1], 0 }
   0x9   :  { %22 = vsyncpa [#allocation9], 0 }
   0xa   :  { %23 = vsyncpa [#allocation12], 0 }
   0xb   :  { %24 = vsyncpa [#allocation15], 0 }
   0xc   :  { %25 = vsyncpa [#allocation4], 0 }
   0xd   :  { %27 = vsyncpa [#allocation4 + $0x1], 0  ;;  %s3169_s17 = smov 0   ;;  %s3171_s18 = smov 0  }
   0xe   :  { %s3173_s19 = smov 0   ;;  %s3175_s20 = smov 0  }
   0xf   :  { %s3177_s21 = smov 0   ;;  %s3179_s22 = smov 0  }
  0x10 LB: > { %3701 = sst [smem:[#allocation24_spill]] %s3066_s17  ;;  %s3200_s23 = sadd.s32 4294967295, %s3086_s22   ;;  %s3086_s22 = sphi %s3179_s22, %s33_s22   ;;  %s3082_s21 = sphi %s3177_s21, %s3742_s21   ;;  %s3078_s20 = sphi %s3175_s20, %s3741_s20   ;;  %s3074_s19 = sphi %s3173_s19, %s3745_s19   ;;  %s3070_s18 = sphi %s3171_s18, %s3744_s18   ;;  %s3066_s17 = sphi %s3169_s17, %s3743_s17  }
  0x11   : > { %3702 = sst [smem:[#allocation25_spill]] %s3082_s21  ;;  %p2269_p0 = scmp.ge.s32.totalorder %s3086_s22, 1 }
  0x12   : > { %3703 = sst [smem:[#allocation26_spill]] %s3086_s22  ;;  %p3680_p1 = scmp.eq.s32.totalorder %s3200_s23, 0 }
  0x13   : > { %p326_p2 = scmp.lt.s32.totalorder %s3086_s22, 3  ;;  %s3088_s25 = smov [#allocation8]  }
  0x14   : > { %s338_s26 = sshll.u32 %s3088_s25, 4  ;;  %s3089_s28 = smov [#allocation11]   ;;  %s339_s26 = int_to_ptr.vmem [resolvable:$true] %s338_s26 }
  0x15   : > { %p3205_p3 = pnand %p2269_p0, %p326_p2  ;;  %s362_s29 = sshll.u32 %s3089_s28, 4  ;;  %s363_s29 = int_to_ptr.vmem [resolvable:$true] %s362_s29 }
  0x16   : > { %s3090_s30 = smov [#allocation14]   ;;  %s2761_s14 = scalar_lea.vmem %s339_s26, 256 }
  0x17   : > { %s3704_s24 = scalar_select %p3205_p3, 1, 0 }
  0x18   : > { %p2596_p4 = pneg %p3205_p3  ;;  %s386_s12 = sshll.u32 %s3090_s30, 4  ;;  %s387_s12 = int_to_ptr.vmem [resolvable:$true] %s386_s12 }
  0x19   : > { %p2762_p8 = scmp.ne.s32.totalorder %s339_s26, %s2761_s14  ;;  %p2769_p11 = scmp.lt.s32.totalorder %s339_s26, %s339_s26 }
  0x1a   : > { %p3214_p6 = pnand %p2596_p4, %p3680_p1  ;;  %p2770_p12 = scmp.lt.s32.totalorder %s2761_s14, %s2761_s14 }
  0x1c   : > { %s3705_s27 = scalar_select %p3214_p6, 1, 0 }
  0x1d   : > { %p3220_p7 = pneg %p3214_p6  ;;  %p2771_p13 = por %p2770_p12, %p2769_p11 }
  0x1f   : > { %p2764_p9 = pnand %p2762_p8, %p3220_p7 }
  0x21   : > { %p2765_p10 = pneg %p2764_p9 }
  0x23   : > { %p2772_p0 = pnand %p2771_p13, %p2765_p10 }
  0x25   : > { %2775 = shalt.err (!%p2772_p0)
}
  0x26   : > { %s3091_s15 = smov 64   ;;  %s3092_s16 = smov 4  }
  0x27   : > { %s3707_s3 = sld [smem:[#allocation31_spill]]  ;;  %s2787_s30 = scalar_lea.vmem %s363_s29, 256 }
  0x28   : > { %p2788_p2 = scmp.ne.s32.totalorder %s363_s29, %s2787_s30  ;;  %p2795_p9 = scmp.lt.s32.totalorder %s363_s29, %s363_s29 }
  0x29   : > { %p2796_p5 = scmp.lt.s32.totalorder %s2787_s30, %s2787_s30 }
  0x2a   : > { %p2790_p4 = pnand %p2788_p2, %p3220_p7 }
  0x2b   : > { %p2797_p1 = por %p2796_p5, %p2795_p9 }
  0x2c   : > { %p2791_p8 = pneg %p2790_p4 }
  0x2d   : > { %2599 = dma.hbm_to_vmem [thread:$0]  (!%p3214_p6), %s3707_s3, 256, %s339_s26, [#allocation9], %s3091_s15, %s3091_s15, %s3092_s16  }
  0x2e   : > { %p2798_p11 = pnand %p2797_p1, %p2791_p8 }
  0x30   : > { %2801 = shalt.err (!%p2798_p11)
}
  0x31   : > { %s3708_s5 = sld [smem:[#allocation32_spill]]  ;;  %s2813_s25 = scalar_lea.vmem %s387_s12, 256 }
  0x32   : > { %p2814_p10 = scmp.ne.s32.totalorder %s387_s12, %s2813_s25  ;;  %p2821_p0 = scmp.lt.s32.totalorder %s387_s12, %s387_s12 }
  0x33   : > { %p2822_p2 = scmp.lt.s32.totalorder %s2813_s25, %s2813_s25 }
  0x34   : > { %p2816_p12 = pnand %p2814_p10, %p3220_p7 }
  0x35   : > { %p2823_p4 = por %p2822_p2, %p2821_p0 }
  0x36   : > { %p2817_p13 = pneg %p2816_p12 }
  0x37   : > { %2605 = dma.hbm_to_vmem [thread:$0]  (!%p3214_p6), %s3708_s5, 256, %s363_s29, [#allocation12], %s3091_s15, %s3091_s15, %s3092_s16  }
  0x38   : > { %p2824_p3 = pnand %p2823_p4, %p2817_p13 }
  0x3a   : > { %2827 = shalt.err (!%p2824_p3)
}
  0x3b   : > { %s3709_s7 = sld [smem:[#allocation33_spill]]  ;;  %s2268_s11 = sadd.s32 4294967294, %s3086_s22  }
  0x3c   : > { %s45_s29 = sadd.s32 1, %s3082_s21  ;;  %s54_s30 = sadd.s32 1, %s3074_s19 }
  0x3d   : > { %p47_p1 = scmp.ge.s32.totalorder %s45_s29, 2  ;;  %p61_p3 = scmp.ne.s32.totalorder %s3074_s19, %s3070_s18 }
  0x3e   : > { %p62_p5 = scmp.eq.s32.totalorder %s3086_s22, 0  ;;  %p67_p8 = scmp.ne.s32.totalorder %s3070_s18, %s3066_s17 }
  0x3f   : > { %s3747_s29 = smov (%p47_p1, %s45_s29), 0  ;;  %p3712_p11 = scmp.eq.s32.totalorder %s3200_s23, 0 }
  0x40   : > { %3710 = sst [smem:[#allocation27_spill]] %s3747_s29  ;;  %p3255_p9 = por %p62_p5, %p61_p3 }
  0x41   : > { %2611 = dma.hbm_to_vmem [thread:$0]  (!%p3214_p6), %s3709_s7, 256, %s387_s12, [#allocation15], %s3091_s15, %s3091_s15, %s3092_s16  }
  0x42   : > { %p3261_p10 = por %p3712_p11, %p67_p8  ;;  %s49_s15 = ssub.s32 %s3082_s21, %s3747_s29 }
  0x43   : > { %p313_p12 = scmp.eq.s32.totalorder %s3200_s23, 1  ;;  %p52_p13 = scmp.eq.s32.totalorder %s49_s15, 0 }
  0x44   : > { %s3713_s12 = scalar_select %p3261_p10, 1, 0 }
  0x45   : > { %p319_p0 = scmp.eq.s32.totalorder %s2268_s11, 1  ;;  %p3268_p2 = por %p313_p12, %p61_p3 }
  0x46   : > { %p2635_p4 = scmp.lt.s32.totalorder %s3086_s22, 2  ;;  %s3685_s28 = sand.u32 1, %s3074_s19  }
  0x47   : > { %s3714_s16 = scalar_select %p3268_p2, 1, 0 }
  0x48   : > { %s3274_s25 = scalar_select %p52_p13, %s3074_s19, %s54_s30  }
  0x49   : > { %3715 = sst [smem:[#allocation28_spill]] %s3714_s16  ;;  %p3276_p1 = por %p319_p0, %p67_p8 }
  0x4a   : > { %3716 = sst [smem:[#allocation29_spill]] %s3274_s25  ;;  %s3283_s3 = sshll.u32 %s3685_s28, 3 }
  0x4b   : > { %s3717_s26 = scalar_select %p3276_p1, 1, 0 }
  0x4c   : > { %s3286_s5 = sshll.u32 %s3082_s21, 7  ;;  %p3290_p3 = pnand %p2635_p4, %p3255_p9 }
  0x4d   : > { %3718 = sst [smem:[#allocation30_spill]] %s3717_s26  ;;  %s436_s30 = sand.u32 1, %s3086_s22  }
  0x4e   : > { %s445_s29 = scalar_lea.hbm %s3669_s1, %s3286_s5  ;;  %s440_s25 = scalar_lea.vmem [#allocation5], %s3283_s3 }
  0x4f   : > { %s447_s26 = sshll.u32 %s440_s25, 4  ;;  %s3093_s28 = smov [#allocation10]   ;;  %s448_s26 = int_to_ptr.vmem [resolvable:$true] %s447_s26 }
  0x50   : > { %s352_s17 = sshll.u32 %s3093_s28, 4  ;;  %s3300_s21 = scalar_lea.sflag [#allocation6], %s436_s30  ;;  %s353_s17 = int_to_ptr.vmem [resolvable:$true] %s352_s17 }
  0x51   : > { %p3692_p5 = pneg %p3290_p3  ;;  %s2841_s14 = scalar_lea.vmem %s448_s26, 128 }
  0x52   : > { %p2842_p8 = scmp.ne.s32.totalorder %s448_s26, %s2841_s14  ;;  %s3094_s22 = smov [#allocation5]  }
  0x53   : > { %s2846_s16 = sshll.u32 %s3094_s22, 4  ;;  %s2847_s16 = int_to_ptr.vmem [resolvable:$false] %s2846_s16 }
  0x54   : > { %p2844_p9 = pnand %p2842_p8, %p3692_p5  ;;  %s2848_s7 = scalar_lea.vmem %s2847_s16, 256 }
  0x55   : > { %p2849_p12 = scmp.lt.s32.totalorder %s448_s26, %s2847_s16  ;;  %p2850_p13 = scmp.lt.s32.totalorder %s2848_s7, %s2841_s14 }
  0x56   : > { %p2845_p11 = pneg %p2844_p9 }
  0x57   : > { %p2851_p0 = por %p2850_p13, %p2849_p12 }
  0x59   : > { %p2852_p4 = pnand %p2851_p0, %p2845_p11 }
  0x5b   : > { %2855 = shalt.err (!%p2852_p4)
}
  0x5c   : > { %2621 = dma.hbm_to_vmem [thread:$0]  (!%p3290_p3), %s445_s29, 128, %s448_s26, %s3300_s21  }
  0x5d   : > { %s2867_s25 = scalar_lea.vmem %s353_s17, 16  ;;  %s2874_s28 = scalar_lea.vmem %s353_s17, 32 }
  0x5e   : > { %p2868_p1 = scmp.ne.s32.totalorder %s353_s17, %s2867_s25  ;;  %p2875_p5 = scmp.lt.s32.totalorder %s353_s17, %s353_s17 }
  0x5f   : > { %p2876_p2 = scmp.lt.s32.totalorder %s2874_s28, %s2867_s25 }
  0x60   : > { %p2870_p8 = pnand %p2868_p1, %p3220_p7 }
  0x61   : > { %p2877_p10 = por %p2876_p2, %p2875_p5 }
  0x62   : > { %p2871_p9 = pneg %p2870_p8 }
  0x64   : > { %p2878_p6 = pnand %p2877_p10, %p2871_p9 }
  0x66   : > { %2881 = shalt.err (!%p2878_p6)
}
  0x67   : > { %p3720_p11 = scmp.ne.s32.totalorder %s3705_s27, 0  ;;  %s3095_s29 = smov [#allocation13]  }
  0x68   : > { %s376_s26 = sshll.u32 %s3095_s29, 4  ;;  %s3096_s30 = smov [#allocation16]   ;;  %s377_s26 = int_to_ptr.vmem [resolvable:$true] %s376_s26 }
  0x69   : > { %2602 = dma.hbm_to_vmem [thread:$0]  (!%p3720_p11), %s3672_s4, 16, %s353_s17, [#allocation9]  }
  0x6a   : > { %s400_s15 = sshll.u32 %s3096_s30, 4  ;;  %s2893_s14 = scalar_lea.vmem %s377_s26, 16  ;;  %s401_s15 = int_to_ptr.vmem [resolvable:$true] %s400_s15 }
  0x6b   : > { %p2894_p1 = scmp.ne.s32.totalorder %s377_s26, %s2893_s14  ;;  %s2900_s7 = scalar_lea.vmem %s377_s26, 32 }
  0x6c   : > { %p2901_p10 = scmp.lt.s32.totalorder %s377_s26, %s377_s26  ;;  %p2902_p6 = scmp.lt.s32.totalorder %s2900_s7, %s2893_s14 }
  0x6d   : > { %p2896_p12 = pnand %p2894_p1, %p3220_p7 }
  0x6e   : > { %p2903_p2 = por %p2902_p6, %p2901_p10 }
  0x6f   : > { %p2897_p13 = pneg %p2896_p12 }
  0x71   : > { %p2904_p5 = pnand %p2903_p2, %p2897_p13 }
  0x73   : > { %2907 = shalt.err (!%p2904_p5)
}
  0x74   : > { %2608 = dma.hbm_to_vmem [thread:$0]  (!%p3720_p11), %s3674_s6, 16, %s377_s26, [#allocation12]  }
  0x75   : > { %s2919_s28 = scalar_lea.vmem %s401_s15, 16  ;;  %s2926_s22 = scalar_lea.vmem %s401_s15, 32 }
  0x76   : > { %p2920_p0 = scmp.ne.s32.totalorder %s401_s15, %s2919_s28  ;;  %p2927_p9 = scmp.lt.s32.totalorder %s401_s15, %s401_s15 }
  0x77   : > { %p2928_p1 = scmp.lt.s32.totalorder %s2926_s22, %s2919_s28 }
  0x78   : > { %p2922_p4 = pnand %p2920_p0, %p3220_p7 }
  0x79   : > { %p2929_p12 = por %p2928_p1, %p2927_p9 }
  0x7a   : > { %p2923_p8 = pneg %p2922_p4 }
  0x7c   : > { %p2930_p10 = pnand %p2929_p12, %p2923_p8 }
  0x7e   : > { %2933 = shalt.err (!%p2930_p10)
}
  0x7f   : > { %2614 = dma.hbm_to_vmem [thread:$0]  (!%p3720_p11), %s3676_s8, 16, %s401_s15, [#allocation15]  }
  0x80   : > { %s427_s30 = scalar_lea.hbm %s3668_s0, %s3286_s5  ;;  %s421_s14 = scalar_lea.vmem [#allocation2], %s3283_s3 }
  0x81   : > { %s429_s7 = sshll.u32 %s421_s14, 4  ;;  %s463_s27 = scalar_lea.hbm %s3670_s2, %s3286_s5  ;;  %s430_s7 = int_to_ptr.vmem [resolvable:$true] %s429_s7 }
  0x82   : > { %s3721_s28 = sand.u32 1, %s3074_s19   ;;  %s2947_s16 = scalar_lea.vmem %s430_s7, 128 }
  0x83   : > { %s418_s22 = scalar_lea.sflag [#allocation3], %s3721_s28  ;;  %p2948_p7 = scmp.ne.s32.totalorder %s430_s7, %s2947_s16 }
  0x84   : > { %p3722_p13 = pneg %p3290_p3  ;;  %s3097_s15 = smov [#allocation2]  }
  0x85   : > { %s2952_s29 = sshll.u32 %s3097_s15, 4  ;;  %s2953_s29 = int_to_ptr.vmem [resolvable:$false] %s2952_s29 }
  0x86   : > { %p2950_p6 = pnand %p2948_p7, %p3722_p13  ;;  %s2954_s13 = scalar_lea.vmem %s2953_s29, 256 }
  0x87   : > { %p2955_p11 = scmp.lt.s32.totalorder %s430_s7, %s2953_s29  ;;  %p2956_p5 = scmp.lt.s32.totalorder %s2954_s13, %s2947_s16 }
  0x88   : > { %p2951_p2 = pneg %p2950_p6 }
  0x89   : > { %p2957_p0 = por %p2956_p5, %p2955_p11 }
  0x8b   : > { %p2958_p4 = pnand %p2957_p0, %p2951_p2 }
  0x8d   : > { %2961 = shalt.err (!%p2958_p4)
}
  0x8e   : > { %2618 = dma.hbm_to_vmem [thread:$0]  (!%p3290_p3), %s427_s30, 128, %s430_s7, %s418_s22  }
  0x8f   : > { %s458_s26 = scalar_lea.vmem [#allocation7], %s3283_s3  ;;  %p3723_p9 = pmov %p3722_p13 }
  0x90   : > { %s465_s14 = sshll.u32 %s458_s26, 4  ;;  %s3098_s17 = smov [#allocation7]   ;;  %s466_s14 = int_to_ptr.vmem [resolvable:$true] %s465_s14 }
  0x91   : > { %s2975_s25 = scalar_lea.vmem %s466_s14, 128  ;;  %s2980_s28 = sshll.u32 %s3098_s17, 4  ;;  %s2981_s28 = int_to_ptr.vmem [resolvable:$false] %s2980_s28 }
  0x92   : > { %p2976_p8 = scmp.ne.s32.totalorder %s466_s14, %s2975_s25  ;;  %s2982_s16 = scalar_lea.vmem %s2981_s28, 256 }
  0x93   : > { %p2983_p10 = scmp.lt.s32.totalorder %s466_s14, %s2981_s28  ;;  %p2984_p7 = scmp.lt.s32.totalorder %s2982_s16, %s2975_s25 }
  0x94   : > { %p2978_p1 = pnand %p2976_p8, %p3723_p9 }
  0x95   : > { %p2985_p13 = por %p2984_p7, %p2983_p10 }
  0x96   : > { %p2979_p12 = pneg %p2978_p1 }
  0x98   : > { %p2986_p6 = pnand %p2985_p13, %p2979_p12 }
  0x9a   : > { %2989 = shalt.err (!%p2986_p6)
}
  0x9b   : > { %2624 = dma.hbm_to_vmem [thread:$0]  (!%p3290_p3), %s463_s27, 128, %s466_s14, %s3300_s21  }
  0x9c   : > { %p3724_p2 = scmp.ne.s32.totalorder %s3704_s24, 0 }
  0x9d   : > { %s3362_s7 = sand.u32 (!%p3724_p2), 1, %s3070_s18   ;;  %p3725_p11 = scmp.ne.s32.totalorder (!%p3724_p2), %s3713_s12, 0 }
  0x9e   : > { %474 = sbr.rel (%p3724_p2) target bundleno = 3623 (0xe27), region = 64  ;;  %s3365_s22 = sshll.u32 (!%p3724_p2), %s3362_s7, 3 }
  0x9f   : > { %s477_s11 = scalar_lea.sflag (!%p3724_p2), [#allocation3], %s3362_s7  ;;  %s480_s15 = scalar_lea.vmem (!%p3724_p2), [#allocation2], %s3365_s22 }
  0xa3   : > { %3041 = dma.done.wait (%p3725_p11), %s477_s11, 128  }
  0xa4   : > { %3043 = vsyncadd (%p3725_p11), %s477_s11, 4294967168  ;;  %s485_s5 = sand.u32 1, %s3200_s23   ;;  %s489_s24 = scalar_lea.vmem [#allocation5], %s3365_s22 }
  0xa5   : > { %s486_s21 = scalar_lea.sflag [#allocation6], %s485_s5 }
  0xa6   : > { %3045 = dma.done.wait (%p3725_p11), %s486_s21, 256  }
  0xa7   : > { %3047 = vsyncadd (%p3725_p11), %s486_s21, 4294967040  ;;  %s498_s27 = scalar_lea.vmem [#allocation7], %s3365_s22  ;;  %p3726_p3 = scmp.eq.s32.totalorder %s3200_s23, 0 }
  0xa9   : > { %3049 = dma.done.wait (%p3726_p3), [#allocation9], 272   ;;  %p3727_p5 = pmov %p3726_p3 }
  0xaa   : > { %p3728_p0 = pmov %p3726_p3 }
  0xab   : > { %3051 = vsyncadd (%p3727_p5), [#allocation9], 4294967024 }
  0xac   : > { %3053 = dma.done.wait (%p3728_p0), [#allocation12], 272   ;;  %p3729_p4 = pmov %p3728_p0 }
  0xad   : > { %p3730_p8 = pmov %p3728_p0 }
  0xae   : > { %3055 = vsyncadd (%p3729_p4), [#allocation12], 4294967024 }
  0xaf   : > { %3057 = dma.done.wait (%p3730_p8), [#allocation15], 272   ;;  %p3731_p9 = pmov %p3728_p0 }
  0xb0   : > { %v3099_v0 = vmov 0.0   ;;  %vm3100_vm0 = vmmov 0   ;;  %v2708_v1 = vld [vmem:[#allocation8 + $0x8] sm:$0xff]   ;;  %v2709_v2 = vld [vmem:[#allocation11 + $0x8] sm:$0xff]   ;;  %v2711_v4 = vld [vmem:[#allocation11] sm:$0xff]   ;;  %vm616_vm1 = vcmask 261120  }
  0xb1   : > { %3059 = vsyncadd (%p3731_p9), [#allocation15], 4294967024  ;;  %2396 = vmatprep.subr.bf16.mxu0 %v3099_v0  ;;  %2404 = vmatprep.subr.bf16.mxu1 %v3099_v0  ;;  %v2710_v3 = vld [vmem:[#allocation8] sm:$0xff]   ;;  %v572_v5 = vld [vmem:[%s480_s15] sm:$0xff]  ;;  %vm785_vm2 = vcmask 31744   ;;  %s3101_s23 = smov 124  }
  0xb2   : > { %2400 = vmatprep.mubr.msk.bf16.mxu0 %vm3100_vm0, %v3099_v0  ;;  %2408 = vmatprep.mubr.msk.bf16.mxu1 %vm3100_vm0, %v3099_v0  ;;  %v574_v6 = vld [vmem:[%s489_s24] sm:$0xff]  ;;  %v573_v7 = vpack.c.bf16 %v572_v5, %v572_v5  ;;  %v576_v11 = vld [vmem:[%s498_s27] sm:$0xff]  ;;  %s3102_s12 = smov 120   ;;  %vm832_vm3 = vcmask 64512   ;;  %vm846_vm4 = vcmask 1043456   ;;  %s3103_s29 = smov 116  }
  0xb3   : > { %2397 = vmatpush3.bf16.msra.mxu0 %v2708_v1  ;;  %2405 = vmatpush3.bf16.msra.mxu1 %v2709_v2  ;;  %v575_v8 = vpack.c.bf16 %v574_v6, %v574_v6  ;;  %v2712_v9 = vld [vmem:[#allocation14 + $0x8] sm:$0xff]   ;;  %v2713_v10 = vld [vmem:[#allocation14] sm:$0xff]   ;;  %v577_v12 = vpack.c.bf16 %v576_v11, %v576_v11  ;;  %v2298_v14 = vld [vmem:[#allocation13] ss:$0 sm:$0xff]  ;;  %vm1014_vm5 = vcmask 1041408   ;;  %s3104_s14 = smov 112  }
  0xb4   : > { %2398 = vmatprep.subr.bf16.mxu0 %v3099_v0  ;;  %2406 = vmatprep.subr.bf16.mxu1 %v3099_v0  ;;  %v2294_v13 = vld [vmem:[#allocation10] ss:$0 sm:$0xff]  ;;  %v2302_v27 = vld [vmem:[#allocation16] ss:$0 sm:$0xff]  ;;  %s3105_s28 = smov 108   ;;  %s3106_s16 = smov 104  }
  0xb5   : > { %v590_v60 = vld [vmem:[%s3677_s9] sm:$0xf]  ;;  %s3107_s11 = smov 100   ;;  %s3732_s27 = sld [smem:[#allocation28_spill]] }
  0xb6   : > { %v1062_v1 = vsel %vm1014_vm5, %v590_v60, 0  ;;  %v2310_v2 = vcombine.low %v590_v60, %v590_v60  ;;  %s3108_s17 = smov [#allocation17]  }
  0xb7   : > { %2399 = vmatpush3.bf16.msra.mxu0 %v2710_v3  ;;  %2407 = vmatpush3.bf16.msra.mxu1 %v2711_v4 }
  0xb8   : > { %2412 = vmatprep.subr.bf16.mxu0 %v3099_v0  ;;  %2420 = vmatprep.subr.bf16.mxu1 %v3099_v0  ;;  %v1010_v3 = vrot.slane %v2310_v2, 2 }
  0xba   : > { %2401 = vmatmul.mubr.msk.bf16.vlgmr.msra.gmra.mxu0 %vm616_vm1, %v573_v7  ;;  %2409 = vmatmul.mubr.msk.bf16.vlgmr.msra.gmra.mxu1 %vm616_vm1, %v575_v8  ;;  %v1016_v4 = vsel %vm1014_vm5, %v1010_v3, 0 }
  0xbb   : > { %2413 = vmatpush3.bf16.msra.mxu0 %v2712_v9  ;;  %2416 = vmatprep.mubr.msk.bf16.mxu0 %vm3100_vm0, %v3099_v0  ;;  %p3734_p12 = scmp.ne.s32.totalorder %s3732_s27, 0 }
  0xbc   : > { %2414 = vmatprep.subr.bf16.mxu0 %v3099_v0  ;;  %2422 = vmatprep.mubr.msk.bf16.mxu1 %vm3100_vm0, %v3099_v0 }
  0xbf   : > { %2415 = vmatpush3.bf16.msra.mxu0 %v2713_v10 }
  0xc0   : > { %2426 = vmatprep.subr.bf16.mxu0 %v3099_v0 }
  0xc2   : > { %2417 = vmatmul.mubr.msk.bf16.vlgmr.msra.gmra.mxu0 %vm616_vm1, %v577_v12 }
  0xc3   : > { %2428 = vmatprep.mubr.msk.bf16.mxu0 %vm3100_vm0, %v3099_v0 }
 0x17a   : > { %v654_v15 = vpop.f32.mrf.mxu0  ;;  %v716_v16 = vpop.f32.mrf.mxu1 }
 0x17b   : > { %v655_v17 = vadd.f32 %v2294_v13, %v654_v15  ;;  %v717_v18 = vadd.f32 %v2298_v14, %v716_v16 }
 0x17c   : > { %v2402_v19 = vpop.f32.mrf.mxu0  ;;  %v2410_v20 = vpop.f32.mrf.mxu1 }
 0x17d   : > { %v3415_v21 = vpack.c.bf16 %v717_v18, %v717_v18  ;;  %v3417_v24 = vpack.c.bf16 %v655_v17, %v655_v17 }
 0x17e   : > { %v657_v22 = vpop.f32.mrf.mxu0  ;;  %v719_v23 = vpop.f32.mrf.mxu1 }
 0x17f   : > { %897 = vrot.lane.b32.xlu0 %v3415_v21, %s3101_s23  ;;  %v790_v26 = vsel %vm785_vm2, %v3415_v21, 0 }
 0x180   : > { %v2403_v25 = vpop.f32.mrf.mxu0  ;;  %v2411_v28 = vpop.f32.mrf.mxu1  ;;  %2421 = vmatpush3.bf16.xpose.msra.mxu1 %v790_v26 }
 0x181   : > { %2432 = vmatprep.subr.bf16.mxu1 %v3099_v0 }
 0x182   : > { %v778_v29 = vpop.f32.mrf.mxu0 }
 0x183   : > { %v779_v30 = vadd.f32 %v2302_v27, %v778_v29  ;;  %894 = vrot.lane.b32.xlu0 %v3417_v24, %s3101_s23 }
 0x184   : > { %v2418_v31 = vpop.f32.mrf.mxu0 }
 0x185   : > { %v3424_v32 = vpack.c.bf16 %v779_v30, %v779_v30 }
 0x186   : > { %v781_v33 = vpop.f32.mrf.mxu0 }
 0x187   : > { %2423 = vmatmul.mubr.msk.bf16.vlgmr.msra.gmra.mxu1 %vm785_vm2, %v3417_v24  ;;  %956 = vrot.lane.b32.xlu0 %v3424_v32, %s3101_s23  ;;  %v848_v43 = vsel %vm846_vm4, %v3424_v32, 0  ;;  %s2336_s23 = sshll.u32 %s3078_s20, 7  ;;  %s2073_s20 = scalar_lea.sflag [#allocation4], %s3362_s7 }
 0x188   : > { %v2419_v34 = vpop.f32.mrf.mxu0  ;;  %2434 = vmatprep.mubr.msk.bf16.mxu1 %vm3100_vm0, %v3099_v0  ;;  %2427 = vmatpush3.bf16.msra.mxu0 %v848_v43 }
 0x189   : > { %2438 = vmatprep.subr.bf16.mxu0 %v3099_v0 }
 0x18b   : > { %1106 = vrot.lane.b32.xlu0 %v3415_v21, %s3102_s12 }
 0x1f1   : > { %v898_v35 = vpop.permute.xlu0 %897 }
 0x1f2   : > { %v903_v36 = vsel %vm785_vm2, %v898_v35, 0 }
 0x1f3   : > { %2433 = vmatpush3.bf16.xpose.msra.mxu1 %v903_v36 }
 0x1f4   : > { %2444 = vmatprep.subr.bf16.mxu1 %v3099_v0 }
 0x1f5   : > { %v895_v37 = vpop.permute.xlu0 %894 }
 0x1f9   : > { %v957_v53 = vpop.permute.xlu0 %956 }
 0x1fa   : > { %2435 = vmatmul.mubr.msk.bf16.vlgmr.msra.gmra.mxu1 %vm785_vm2, %v895_v37  ;;  %v962_v54 = vsel %vm846_vm4, %v957_v53, 0 }
 0x1fb   : > { %2446 = vmatprep.mubr.msk.bf16.mxu1 %vm3100_vm0, %v3099_v0  ;;  %2445 = vmatpush3.bf16.msra.mxu1 %v1016_v4 }
 0x1fc   : > { %2456 = vmatprep.subr.bf16.mxu1 %v3099_v0 }
 0x1fd   : > { %v1107_v5 = vpop.permute.xlu0 %1106 }
 0x1fe   : > { %v1112_v25 = vsel %vm785_vm2, %v1107_v5, 0 }
 0x247   : > { %v826_v38 = vpop.f32.mrf.mxu1 }
 0x248   : > { %v833_v39 = vsel %vm832_vm3, %v826_v38, -inf }
 0x249   : > { %834 = vmax.xlane.f32.xlu1 %v833_v39  ;;  %v2424_v40 = vpop.f32.mrf.mxu1 }
 0x24b   : > { %v829_v41 = vpop.f32.mrf.mxu1 }
 0x24d   : > { %v2425_v42 = vpop.f32.mrf.mxu1 }
 0x2ba   : > { %v939_v44 = vpop.f32.mrf.mxu1 }
 0x2bb   : > { %v945_v45 = vsel %vm832_vm3, %v939_v44, -inf }
 0x2bc   : > { %946 = vmax.xlane.f32.xlu1 %v945_v45  ;;  %v2436_v46 = vpop.f32.mrf.mxu1 }
 0x2be   : > { %v942_v47 = vpop.f32.mrf.mxu1 }
 0x2c0   : > { %v2437_v48 = vpop.f32.mrf.mxu1 }
 0x2d2   : > { %v835_v49 = vpop.xlane.xlu1 %834 }
 0x2d3   : > { %v836_v50 = vsub.f32 %v826_v38, %v835_v49 }
 0x2d5   : > { %v837_v51 = vmul.f32 1.442695, %v836_v50 }
 0x2d7   : > { %2718 = vpow2.f32 %v837_v51  ;;  %v591_v51 = vld [vmem:[%s3677_s9 + $0x4] sm:$0xf] }
 0x2e4   : > { %v2719_v52 = vpop.eup %2718 }
 0x2e5   : > { %v839_v55 = vsel %vm832_vm3, %v2719_v52, 0.0  ;;  %v842_v56 = vpack.c.bf16 %v2719_v52, %v2719_v52  ;;  %v1219_v52 = vsel %vm1014_vm5, %v591_v51, 0 }
 0x2e6   : > { %840 = vadd.xlane.f32.xlu0 %v839_v55 }
 0x2e7   : > { %2429 = vmatmul.mubr.msk.bf16.vlgmr.msra.gmra.mxu0 %vm832_vm3, %v842_v56 }
 0x2e8   : > { %2439 = vmatpush3.bf16.msra.mxu0 %v962_v54  ;;  %2440 = vmatprep.mubr.msk.bf16.mxu0 %vm3100_vm0, %v3099_v0 }
 0x2e9   : > { %2450 = vmatprep.subr.bf16.mxu0 %v3099_v0 }
 0x2fc   : > { %1164 = vrot.lane.b32.xlu0 %v3424_v32, %s3102_s12 }
 0x300   : > { %1262 = vrot.lane.b32.xlu0 %v3417_v24, %s3103_s29 }
 0x345   : > { %v947_v57 = vpop.xlane.xlu1 %946 }
 0x346   : > { %v948_v58 = vsub.f32 %v939_v44, %v947_v57 }
 0x348   : > { %v949_v59 = vmul.f32 1.442695, %v948_v58 }
 0x34a   : > { %2720 = vpow2.f32 %v949_v59 }
 0x357   : > { %v2721_v61 = vpop.eup %2720 }
 0x358   : > { %v951_v62 = vsel %vm832_vm3, %v2721_v61, 0.0  ;;  %v954_v63 = vpack.c.bf16 %v2721_v61, %v2721_v61 }
 0x359   : > { %952 = vadd.xlane.f32.xlu1 %v951_v62 }
 0x35a   : > { %2441 = vmatmul.mubr.msk.bf16.vlgmr.msra.gmra.mxu0 %vm832_vm3, %v954_v63 }
 0x35b   : > { %2451 = vmatpush3.bf16.msra.mxu0 %v1062_v1  ;;  %2452 = vmatprep.mubr.msk.bf16.mxu0 %vm3100_vm0, %v3099_v0 }
 0x35c   : > { %2462 = vmatprep.subr.bf16.mxu0 %v3099_v0 }
 0x36a   : > { %1104 = vrot.lane.b32.xlu1 %v3417_v24, %s3102_s12  ;;  %s570_s12 = scalar_lea.vmem [#allocation17], %s3365_s22 }
 0x36f   : > { %v841_v6 = vpop.xlane.xlu0 %840 }
 0x370   : > { %2722 = vrcp.f32 %v841_v6 }
 0x373   : > { %v1165_v10 = vpop.permute.xlu0 %1164 }
 0x374   : > { %v1170_v14 = vsel %vm846_vm4, %v1165_v10, 0 }
 0x377   : > { %v1263_v50 = vpop.permute.xlu0 %1262 }
 0x37d   : > { %v2723_v7 = vpop.eup %2722 }
 0x3a7   : > { %v884_v8 = vpop.f32.mrf.mxu0 }
 0x3a8   : > { %v891_v9 = vmul.f32 %v2723_v7, %v884_v8 }
 0x3a9   : > { %v2430_v11 = vpop.f32.mrf.mxu0 }
 0x3aa   : > { %v892_v12 = vpack.c.bf16 %v891_v9, %v891_v9 }
 0x3ab   : > { %v887_v13 = vpop.f32.mrf.mxu0 }
 0x3ac   : > { %2453 = vmatmul.mubr.msk.bf16.vlgmr.msra.gmra.mxu0 %vm785_vm2, %v892_v12 }
 0x3ad   : > { %2463 = vmatpush3.bf16.msra.mxu0 %v1170_v14  ;;  %v2431_v15 = vpop.f32.mrf.mxu0  ;;  %2464 = vmatprep.mubr.msk.bf16.mxu0 %vm3100_vm0, %v3099_v0 }
 0x3ae   : > { %2474 = vmatprep.subr.bf16.mxu0 %v3099_v0 }
 0x3e2   : > { %v953_v16 = vpop.xlane.xlu1 %952 }
 0x3e3   : > { %2724 = vrcp.f32 %v953_v16 }
 0x3e6   : > { %v1105_v27 = vpop.permute.xlu1 %1104 }
 0x3f0   : > { %v2725_v17 = vpop.eup %2724 }
 0x41a   : > { %v998_v18 = vpop.f32.mrf.mxu0 }
 0x41b   : > { %v1005_v19 = vmul.f32 %v2725_v17, %v998_v18 }
 0x41c   : > { %v2442_v20 = vpop.f32.mrf.mxu0 }
 0x41d   : > { %v1006_v22 = vpack.c.bf16 %v1005_v19, %v1005_v19  ;;  %v2318_v20 = vcombine.low %v591_v51, %v591_v51 }
 0x41e   : > { %v1001_v23 = vpop.f32.mrf.mxu0 }
 0x41f   : > { %2447 = vmatmul.mubr.msk.bf16.vlgmr.msra.gmra.mxu1 %vm785_vm2, %v1006_v22  ;;  %v1376_v22 = vrot.slane %v2318_v20, 2 }
 0x420   : > { %2457 = vmatpush3.bf16.xpose.msra.mxu1 %v1112_v25  ;;  %v2443_v26 = vpop.f32.mrf.mxu0  ;;  %2458 = vmatprep.mubr.msk.bf16.mxu1 %vm3100_vm0, %v3099_v0 }
 0x421   : > { %2468 = vmatprep.subr.bf16.mxu1 %v3099_v0  ;;  %v1381_v23 = vsel %vm1014_vm5, %v1376_v22, 0 }
 0x427   : > { %2459 = vmatmul.mubr.msk.bf16.vlgmr.msra.gmra.mxu1 %vm785_vm2, %v1105_v27 }
 0x428   : > { %2470 = vmatprep.mubr.msk.bf16.mxu1 %vm3100_vm0, %v3099_v0  ;;  %2469 = vmatpush3.bf16.msra.mxu1 %v1219_v52 }
 0x429   : > { %2480 = vmatprep.subr.bf16.mxu1 %v3099_v0 }
 0x46c   : > { %v3479_v28 = vpop.f32.mrf.mxu0 }
 0x46e   : > { %v2454_v29 = vpop.f32.mrf.mxu0 }
 0x470   : > { %v1101_v30 = vpop.f32.mrf.mxu0 }
 0x472   : > { %v2455_v31 = vpop.f32.mrf.mxu0 }
 0x4df   : > { %v3481_v33 = vpop.f32.mrf.mxu1 }
 0x4e0   : > { %v1099_v14 = vadd.f32 %v3479_v28, %v3481_v33 }
 0x4e1   : > { %v2448_v34 = vpop.f32.mrf.mxu1 }
 0x4e3   : > { %v1055_v35 = vpop.f32.mrf.mxu1 }
 0x4e5   : > { %v2449_v36 = vpop.f32.mrf.mxu1 }
 0x4e7   : > { %v1148_v37 = vpop.f32.mrf.mxu1 }
 0x4e8   : > { %v1154_v38 = vsel %vm832_vm3, %v1148_v37, -inf }
 0x4e9   : > { %1155 = vmax.xlane.f32.xlu1 %v1154_v38  ;;  %v2460_v39 = vpop.f32.mrf.mxu1 }
 0x4eb   : > { %v1151_v40 = vpop.f32.mrf.mxu1 }
 0x4ed   : > { %v2461_v41 = vpop.f32.mrf.mxu1 }
 0x4fa   : > { %1264 = vrot.lane.b32.xlu1 %v3415_v21, %s3103_s29 }
 0x572   : > { %v1156_v42 = vpop.xlane.xlu1 %1155 }
 0x573   : > { %v1157_v43 = vsub.f32 %v1148_v37, %v1156_v42 }
 0x575   : > { %v1158_v44 = vmul.f32 1.442695, %v1157_v43 }
 0x576   : > { %v1265_v46 = vpop.permute.xlu1 %1264 }
 0x577   : > { %2726 = vpow2.f32 %v1158_v44  ;;  %v1270_v49 = vsel %vm785_vm2, %v1265_v46, 0 }
 0x584   : > { %v2727_v45 = vpop.eup %2726 }
 0x585   : > { %v1160_v47 = vsel %vm832_vm3, %v2727_v45, 0.0  ;;  %v1163_v48 = vpack.c.bf16 %v2727_v45, %v2727_v45 }
 0x586   : > { %1161 = vadd.xlane.f32.xlu0 %v1160_v47 }
 0x587   : > { %2465 = vmatmul.mubr.msk.bf16.vlgmr.msra.gmra.mxu0 %vm832_vm3, %v1163_v48 }
 0x588   : > { %2475 = vmatpush3.bf16.xpose.msra.mxu0 %v1270_v49  ;;  %2476 = vmatprep.mubr.msk.bf16.mxu0 %vm3100_vm0, %v3099_v0 }
 0x589   : > { %2486 = vmatprep.subr.bf16.mxu0 %v3099_v0 }
 0x58f   : > { %2477 = vmatmul.mubr.msk.bf16.vlgmr.msra.gmra.mxu0 %vm785_vm2, %v1263_v50 }
 0x590   : > { %2488 = vmatprep.mubr.msk.bf16.mxu0 %vm3100_vm0, %v3099_v0  ;;  %2487 = vmatpush3.bf16.msra.mxu0 %v1381_v23 }
 0x591   : > { %2498 = vmatprep.subr.bf16.mxu0 %v3099_v0 }
 0x59c   : > { %1322 = vrot.lane.b32.xlu0 %v3424_v32, %s3103_s29  ;;  %s2087_s29 = sshll.u32 %s570_s12, 4  ;;  %s3621_s29 = int_to_ptr.vmem [resolvable:$true] %s2087_s29 }
 0x59d   : > { %s2990_s22 = scalar_lea.vmem %s3621_s29, 128 }
 0x59e   : > { %p2991_p1 = scmp.ne.s32.totalorder %s3621_s29, %s2990_s22 }
 0x5a0   : > { %1424 = vrot.lane.b32.xlu0 %v3417_v24, %s3104_s14  ;;  %p2992_p10 = pnand %p2991_p1, %p3734_p12 }
 0x5a2   : > { %p2993_p7 = pneg %p2992_p10 }
 0x60f   : > { %v1162_v53 = vpop.xlane.xlu0 %1161 }
 0x610   : > { %2728 = vrcp.f32 %v1162_v53 }
 0x613   : > { %v1323_v57 = vpop.permute.xlu0 %1322 }
 0x614   : > { %v1328_v61 = vsel %vm846_vm4, %v1323_v57, 0 }
 0x617   : > { %v1425_v13 = vpop.permute.xlu0 %1424 }
 0x61d   : > { %v2729_v54 = vpop.eup %2728 }
 0x647   : > { %v1206_v55 = vpop.f32.mrf.mxu0 }
 0x648   : > { %v1213_v56 = vmul.f32 %v2729_v54, %v1206_v55  ;;  %v592_v55 = vld [vmem:[%s3677_s9 + $0x8] sm:$0xf] }
 0x649   : > { %v2466_v58 = vpop.f32.mrf.mxu0 }
 0x64a   : > { %v1214_v59 = vpack.c.bf16 %v1213_v56, %v1213_v56  ;;  %v1539_v56 = vsel %vm1014_vm5, %v592_v55, 0 }
 0x64b   : > { %v1209_v60 = vpop.f32.mrf.mxu0 }
 0x64c   : > { %2471 = vmatmul.mubr.msk.bf16.vlgmr.msra.gmra.mxu1 %vm785_vm2, %v1214_v59 }
 0x64d   : > { %2481 = vmatpush3.bf16.msra.mxu1 %v1328_v61  ;;  %v2467_v62 = vpop.f32.mrf.mxu0  ;;  %2482 = vmatprep.mubr.msk.bf16.mxu1 %vm3100_vm0, %v3099_v0 }
 0x64e   : > { %2492 = vmatprep.subr.bf16.mxu1 %v3099_v0 }
 0x64f   : > { %v1306_v63 = vpop.f32.mrf.mxu0 }
 0x650   : > { %v1312_v1 = vsel %vm832_vm3, %v1306_v63, -inf }
 0x651   : > { %1313 = vmax.xlane.f32.xlu1 %v1312_v1  ;;  %v2478_v2 = vpop.f32.mrf.mxu0 }
 0x653   : > { %v1309_v3 = vpop.f32.mrf.mxu0 }
 0x655   : > { %v2479_v4 = vpop.f32.mrf.mxu0 }
 0x662   : > { %1426 = vrot.lane.b32.xlu1 %v3415_v21, %s3104_s14 }
 0x6da   : > { %v1314_v5 = vpop.xlane.xlu1 %1313 }
 0x6db   : > { %v1315_v6 = vsub.f32 %v1306_v63, %v1314_v5 }
 0x6dd   : > { %v1316_v7 = vmul.f32 1.442695, %v1315_v6 }
 0x6de   : > { %v1427_v9 = vpop.permute.xlu1 %1426 }
 0x6df   : > { %2730 = vpow2.f32 %v1316_v7  ;;  %v1432_v12 = vsel %vm785_vm2, %v1427_v9, 0 }
 0x6ec   : > { %v2731_v8 = vpop.eup %2730 }
 0x6ed   : > { %v1318_v10 = vsel %vm832_vm3, %v2731_v8, 0.0  ;;  %v1321_v11 = vpack.c.bf16 %v2731_v8, %v2731_v8 }
 0x6ee   : > { %1319 = vadd.xlane.f32.xlu0 %v1318_v10 }
 0x6ef   : > { %2483 = vmatmul.mubr.msk.bf16.vlgmr.msra.gmra.mxu1 %vm832_vm3, %v1321_v11 }
 0x6f0   : > { %2493 = vmatpush3.bf16.xpose.msra.mxu1 %v1432_v12  ;;  %2494 = vmatprep.mubr.msk.bf16.mxu1 %vm3100_vm0, %v3099_v0 }
 0x6f1   : > { %2504 = vmatprep.subr.bf16.mxu1 %v3099_v0 }
 0x6f7   : > { %2495 = vmatmul.mubr.msk.bf16.vlgmr.msra.gmra.mxu1 %vm785_vm2, %v1425_v13 }
 0x6f8   : > { %2506 = vmatprep.mubr.msk.bf16.mxu1 %vm3100_vm0, %v3099_v0  ;;  %2505 = vmatpush3.bf16.msra.mxu1 %v1539_v56  ;;  %v593_v56 = vld [vmem:[%s3677_s9 + $0xc] sm:$0xf] }
 0x6f9   : > { %2516 = vmatprep.subr.bf16.mxu1 %v3099_v0 }
 0x704   : > { %1484 = vrot.lane.b32.xlu0 %v3424_v32, %s3104_s14  ;;  %s3733_s14 = sld [smem:[#allocation34_spill]] }
 0x708   : > { %1582 = vrot.lane.b32.xlu0 %v3417_v24, %s3105_s28 }
 0x70a   : > { %s3619_s25 = scalar_lea.hbm %s3733_s14, %s2336_s23 }
 0x70c   : > { %v1255_v15 = vpop.f32.mrf.mxu1 }
 0x70d   : > { %v1261_v16 = vadd.f32 %v1255_v15, %v1099_v14 }
 0x70e   : > { %v2472_v17 = vpop.f32.mrf.mxu1 }
 0x710   : > { %v1258_v18 = vpop.f32.mrf.mxu1 }
 0x712   : > { %v2473_v19 = vpop.f32.mrf.mxu1 }
 0x777   : > { %v1320_v25 = vpop.xlane.xlu0 %1319 }
 0x778   : > { %2732 = vrcp.f32 %v1320_v25  ;;  %v2325_v25 = vcombine.low %v592_v55, %v592_v55 }
 0x77b   : > { %v1485_v30 = vpop.permute.xlu0 %1484 }
 0x77c   : > { %v1490_v34 = vsel %vm846_vm4, %v1485_v30, 0 }
 0x77f   : > { %v1583_v49 = vpop.permute.xlu0 %1582 }
 0x785   : > { %v2733_v26 = vpop.eup %2732 }
 0x7af   : > { %v1364_v27 = vpop.f32.mrf.mxu1 }
 0x7b0   : > { %v1371_v29 = vmul.f32 %v2733_v26, %v1364_v27  ;;  %v1696_v26 = vrot.slane %v2325_v25, 2 }
 0x7b1   : > { %v2484_v31 = vpop.f32.mrf.mxu1 }
 0x7b2   : > { %v1372_v28 = vpack.c.bf16 %v1371_v29, %v1371_v29  ;;  %v1701_v27 = vsel %vm1014_vm5, %v1696_v26, 0 }
 0x7b3   : > { %v1367_v33 = vpop.f32.mrf.mxu1 }
 0x7b4   : > { %2489 = vmatmul.mubr.msk.bf16.vlgmr.msra.gmra.mxu0 %vm785_vm2, %v1372_v28 }
 0x7b5   : > { %2499 = vmatpush3.bf16.msra.mxu0 %v1490_v34  ;;  %v2485_v35 = vpop.f32.mrf.mxu1  ;;  %2500 = vmatprep.mubr.msk.bf16.mxu0 %vm3100_vm0, %v3099_v0 }
 0x7b6   : > { %2510 = vmatprep.subr.bf16.mxu0 %v3099_v0 }
 0x7b7   : > { %v1468_v36 = vpop.f32.mrf.mxu1 }
 0x7b8   : > { %v1474_v37 = vsel %vm832_vm3, %v1468_v36, -inf }
 0x7b9   : > { %1475 = vmax.xlane.f32.xlu1 %v1474_v37  ;;  %v2496_v38 = vpop.f32.mrf.mxu1 }
 0x7bb   : > { %v1471_v39 = vpop.f32.mrf.mxu1 }
 0x7bd   : > { %v2497_v40 = vpop.f32.mrf.mxu1 }
 0x7ca   : > { %1584 = vrot.lane.b32.xlu1 %v3415_v21, %s3105_s28 }
 0x842   : > { %v1476_v41 = vpop.xlane.xlu1 %1475 }
 0x843   : > { %v1477_v42 = vsub.f32 %v1468_v36, %v1476_v41 }
 0x845   : > { %v1478_v43 = vmul.f32 1.442695, %v1477_v42 }
 0x846   : > { %v1585_v45 = vpop.permute.xlu1 %1584 }
 0x847   : > { %2734 = vpow2.f32 %v1478_v43  ;;  %v1590_v48 = vsel %vm785_vm2, %v1585_v45, 0 }
 0x854   : > { %v2735_v44 = vpop.eup %2734 }
 0x855   : > { %v1480_v46 = vsel %vm832_vm3, %v2735_v44, 0.0  ;;  %v1483_v47 = vpack.c.bf16 %v2735_v44, %v2735_v44 }
 0x856   : > { %1481 = vadd.xlane.f32.xlu0 %v1480_v46 }
 0x857   : > { %2501 = vmatmul.mubr.msk.bf16.vlgmr.msra.gmra.mxu0 %vm832_vm3, %v1483_v47 }
 0x858   : > { %2511 = vmatpush3.bf16.xpose.msra.mxu0 %v1590_v48  ;;  %2512 = vmatprep.mubr.msk.bf16.mxu0 %vm3100_vm0, %v3099_v0 }
 0x859   : > { %2522 = vmatprep.subr.bf16.mxu0 %v3099_v0 }
 0x85f   : > { %2513 = vmatmul.mubr.msk.bf16.vlgmr.msra.gmra.mxu0 %vm785_vm2, %v1583_v49 }
 0x860   : > { %2524 = vmatprep.mubr.msk.bf16.mxu0 %vm3100_vm0, %v3099_v0  ;;  %2523 = vmatpush3.bf16.msra.mxu0 %v1701_v27 }
 0x861   : > { %2534 = vmatprep.subr.bf16.mxu0 %v3099_v0 }
 0x86c   : > { %1642 = vrot.lane.b32.xlu0 %v3424_v32, %s3105_s28  ;;  %s2994_s28 = sshll.u32 %s3108_s17, 4  ;;  %s2995_s28 = int_to_ptr.vmem [resolvable:$false] %s2994_s28 }
 0x86d   : > { %p2997_p13 = scmp.lt.s32.totalorder %s3621_s29, %s2995_s28 }
 0x870   : > { %1744 = vrot.lane.b32.xlu0 %v3417_v24, %s3106_s16 }
 0x874   : > { %v1417_v50 = vpop.f32.mrf.mxu0 }
 0x875   : > { %v1423_v51 = vadd.f32 %v1417_v50, %v1261_v16 }
 0x876   : > { %v2490_v52 = vpop.f32.mrf.mxu0 }
 0x878   : > { %v1420_v53 = vpop.f32.mrf.mxu0 }
 0x87a   : > { %v2491_v54 = vpop.f32.mrf.mxu0 }
 0x8df   : > { %v1482_v57 = vpop.xlane.xlu0 %1481 }
 0x8e0   : > { %2736 = vrcp.f32 %v1482_v57  ;;  %v1859_v57 = vsel %vm1014_vm5, %v593_v56, 0 }
 0x8e3   : > { %v1643_v61 = vpop.permute.xlu0 %1642 }
 0x8e4   : > { %v1648_v2 = vsel %vm846_vm4, %v1643_v61, 0 }
 0x8e7   : > { %v1745_v17 = vpop.permute.xlu0 %1744 }
 0x8ed   : > { %v2737_v58 = vpop.eup %2736 }
 0x917   : > { %v1526_v59 = vpop.f32.mrf.mxu0 }
 0x918   : > { %v1533_v60 = vmul.f32 %v2737_v58, %v1526_v59 }
 0x919   : > { %v2502_v62 = vpop.f32.mrf.mxu0 }
 0x91a   : > { %v1534_v63 = vpack.c.bf16 %v1533_v60, %v1533_v60 }
 0x91b   : > { %v1529_v1 = vpop.f32.mrf.mxu0 }
 0x91c   : > { %2507 = vmatmul.mubr.msk.bf16.vlgmr.msra.gmra.mxu1 %vm785_vm2, %v1534_v63 }
 0x91d   : > { %2517 = vmatpush3.bf16.msra.mxu1 %v1648_v2  ;;  %v2503_v3 = vpop.f32.mrf.mxu0  ;;  %2518 = vmatprep.mubr.msk.bf16.mxu1 %vm3100_vm0, %v3099_v0 }
 0x91e   : > { %2528 = vmatprep.subr.bf16.mxu1 %v3099_v0 }
 0x91f   : > { %v1626_v4 = vpop.f32.mrf.mxu0 }
 0x920   : > { %v1632_v5 = vsel %vm832_vm3, %v1626_v4, -inf }
 0x921   : > { %1633 = vmax.xlane.f32.xlu1 %v1632_v5  ;;  %v2514_v6 = vpop.f32.mrf.mxu0 }
 0x923   : > { %v1629_v7 = vpop.f32.mrf.mxu0 }
 0x925   : > { %v2515_v8 = vpop.f32.mrf.mxu0 }
 0x932   : > { %1746 = vrot.lane.b32.xlu1 %v3415_v21, %s3106_s16 }
 0x9aa   : > { %v1634_v9 = vpop.xlane.xlu1 %1633 }
 0x9ab   : > { %v1635_v10 = vsub.f32 %v1626_v4, %v1634_v9 }
 0x9ad   : > { %v1636_v11 = vmul.f32 1.442695, %v1635_v10 }
 0x9ae   : > { %v1747_v13 = vpop.permute.xlu1 %1746 }
 0x9af   : > { %2738 = vpow2.f32 %v1636_v11  ;;  %v1752_v16 = vsel %vm785_vm2, %v1747_v13, 0 }
 0x9bc   : > { %v2739_v12 = vpop.eup %2738 }
 0x9bd   : > { %v1638_v14 = vsel %vm832_vm3, %v2739_v12, 0.0  ;;  %v1641_v15 = vpack.c.bf16 %v2739_v12, %v2739_v12 }
 0x9be   : > { %1639 = vadd.xlane.f32.xlu1 %v1638_v14 }
 0x9bf   : > { %2519 = vmatmul.mubr.msk.bf16.vlgmr.msra.gmra.mxu1 %vm832_vm3, %v1641_v15  ;;  %v2332_v15 = vcombine.low %v593_v56, %v593_v56 }
 0x9c0   : > { %2529 = vmatpush3.bf16.xpose.msra.mxu1 %v1752_v16  ;;  %2530 = vmatprep.mubr.msk.bf16.mxu1 %vm3100_vm0, %v3099_v0 }
 0x9c1   : > { %2540 = vmatprep.subr.bf16.mxu1 %v3099_v0 }
 0x9c7   : > { %2531 = vmatmul.mubr.msk.bf16.vlgmr.msra.gmra.mxu1 %vm785_vm2, %v1745_v17 }
 0x9c8   : > { %2542 = vmatprep.mubr.msk.bf16.mxu1 %vm3100_vm0, %v3099_v0  ;;  %2541 = vmatpush3.bf16.msra.mxu1 %v1859_v57 }
 0x9c9   : > { %2552 = vmatprep.subr.bf16.mxu1 %v3099_v0 }
 0x9cf   : > { %1904 = vrot.lane.b32.xlu1 %v3415_v21, %s3107_s11 }
 0x9d3   : > { %1902 = vrot.lane.b32.xlu1 %v3417_v24, %s3107_s11 }
 0x9dc   : > { %v1575_v18 = vpop.f32.mrf.mxu1 }
 0x9dd   : > { %v1581_v19 = vadd.f32 %v1575_v18, %v1423_v51 }
 0x9de   : > { %v2508_v20 = vpop.f32.mrf.mxu1 }
 0x9e0   : > { %v1578_v22 = vpop.f32.mrf.mxu1 }
 0x9e2   : > { %v2509_v23 = vpop.f32.mrf.mxu1 }
 0xa47   : > { %v1640_v29 = vpop.xlane.xlu1 %1639 }
 0xa48   : > { %2740 = vrcp.f32 %v1640_v29 }
 0xa4b   : > { %v1905_v46 = vpop.permute.xlu1 %1904 }
 0xa4c   : > { %v1910_v49 = vsel %vm785_vm2, %v1905_v46, 0 }
 0xa4f   : > { %v1903_v50 = vpop.permute.xlu1 %1902 }
 0xa55   : > { %v2741_v30 = vpop.eup %2740 }
 0xa7f   : > { %v1684_v31 = vpop.f32.mrf.mxu1 }
 0xa80   : > { %v1691_v21 = vmul.f32 %v2741_v30, %v1684_v31 }
 0xa81   : > { %v2520_v28 = vpop.f32.mrf.mxu1 }
 0xa82   : > { %v1692_v33 = vpack.c.bf16 %v1691_v21, %v1691_v21  ;;  %v2334_v28 = vld [vmem:[%s3678_s10] ss:$0 sm:$0xff] }
 0xa83   : > { %v1687_v24 = vpop.f32.mrf.mxu1 }
 0xa84   : > { %2525 = vmatmul.mubr.msk.bf16.vlgmr.msra.gmra.mxu0 %vm785_vm2, %v1692_v33 }
 0xa85   : > { %v2521_v34 = vpop.f32.mrf.mxu1  ;;  %2536 = vmatprep.mubr.msk.bf16.mxu0 %vm3100_vm0, %v3099_v0 }
 0xa87   : > { %v1788_v35 = vpop.f32.mrf.mxu1 }
 0xa88   : > { %v1794_v36 = vsel %vm832_vm3, %v1788_v35, -inf }
 0xa89   : > { %1795 = vmax.xlane.f32.xlu0 %v1794_v36  ;;  %v2532_v37 = vpop.f32.mrf.mxu1 }
 0xa8b   : > { %v1791_v38 = vpop.f32.mrf.mxu1 }
 0xa8d   : > { %v2533_v39 = vpop.f32.mrf.mxu1 }
 0xa9f   : > { %1804 = vrot.lane.b32.xlu0 %v3424_v32, %s3106_s16  ;;  %s2996_s16 = scalar_lea.vmem %s2995_s28, 256 }
 0xaa0   : > { %p2998_p6 = scmp.lt.s32.totalorder %s2996_s16, %s2990_s22 }
 0xaa2   : > { %p2999_p2 = por %p2998_p6, %p2997_p13 }
 0xaa4   : > { %p3000_p11 = pnand %p2999_p2, %p2993_p7 }
 0xb12   : > { %v1796_v40 = vpop.xlane.xlu0 %1795 }
 0xb13   : > { %v1797_v41 = vsub.f32 %v1788_v35, %v1796_v40 }
 0xb15   : > { %v1798_v42 = vmul.f32 1.442695, %v1797_v41 }
 0xb16   : > { %v1805_v43 = vpop.permute.xlu0 %1804 }
 0xb17   : > { %2742 = vpow2.f32 %v1798_v42  ;;  %v1810_v44 = vsel %vm846_vm4, %v1805_v43, 0 }
 0xb18   : > { %2535 = vmatpush3.bf16.msra.mxu0 %v1810_v44 }
 0xb19   : > { %2546 = vmatprep.subr.bf16.mxu0 %v3099_v0 }
 0xb24   : > { %v2743_v45 = vpop.eup %2742 }
 0xb25   : > { %v1800_v47 = vsel %vm832_vm3, %v2743_v45, 0.0  ;;  %v1803_v48 = vpack.c.bf16 %v2743_v45, %v2743_v45 }
 0xb26   : > { %1801 = vadd.xlane.f32.xlu0 %v1800_v47 }
 0xb27   : > { %2537 = vmatmul.mubr.msk.bf16.vlgmr.msra.gmra.mxu0 %vm832_vm3, %v1803_v48 }
 0xb28   : > { %2547 = vmatpush3.bf16.xpose.msra.mxu0 %v1910_v49  ;;  %2548 = vmatprep.mubr.msk.bf16.mxu0 %vm3100_vm0, %v3099_v0 }
 0xb29   : > { %2558 = vmatprep.subr.bf16.mxu0 %v3099_v0 }
 0xb2f   : > { %2549 = vmatmul.mubr.msk.bf16.vlgmr.msra.gmra.mxu0 %vm785_vm2, %v1903_v50 }
 0xb30   : > { %2560 = vmatprep.mubr.msk.bf16.mxu0 %vm3100_vm0, %v3099_v0 }
 0xb3c   : > { %1962 = vrot.lane.b32.xlu0 %v3424_v32, %s3107_s11 }
 0xb44   : > { %v1737_v51 = vpop.f32.mrf.mxu0 }
 0xb45   : > { %v1743_v52 = vadd.f32 %v1737_v51, %v1581_v19 }
 0xb46   : > { %v2526_v53 = vpop.f32.mrf.mxu0 }
 0xb48   : > { %v1740_v54 = vpop.f32.mrf.mxu0 }
 0xb4a   : > { %v2527_v55 = vpop.f32.mrf.mxu0 }
 0xbaf   : > { %v1802_v58 = vpop.xlane.xlu0 %1801 }
 0xbb0   : > { %2744 = vrcp.f32 %v1802_v58 }
 0xbb3   : > { %v1963_v32 = vpop.permute.xlu0 %1962 }
 0xbb4   : > { %v1968_v2 = vsel %vm846_vm4, %v1963_v32, 0 }
 0xbbd   : > { %v2745_v59 = vpop.eup %2744 }
 0xbe7   : > { %v1846_v60 = vpop.f32.mrf.mxu0 }
 0xbe8   : > { %v1853_v61 = vmul.f32 %v2745_v59, %v1846_v60 }
 0xbe9   : > { %v2538_v62 = vpop.f32.mrf.mxu0 }
 0xbea   : > { %v1854_v63 = vpack.c.bf16 %v1853_v61, %v1853_v61 }
 0xbeb   : > { %v1849_v1 = vpop.f32.mrf.mxu0 }
 0xbec   : > { %2543 = vmatmul.mubr.msk.bf16.vlgmr.msra.gmra.mxu1 %vm785_vm2, %v1854_v63 }
 0xbed   : > { %2553 = vmatpush3.bf16.msra.mxu1 %v1968_v2  ;;  %v2539_v3 = vpop.f32.mrf.mxu0  ;;  %2554 = vmatprep.mubr.msk.bf16.mxu1 %vm3100_vm0, %v3099_v0  ;;  %v2016_v0 = vrot.slane %v2332_v15, 2 }
 0xbef   : > { %v1946_v4 = vpop.f32.mrf.mxu0  ;;  %v2021_v16 = vsel %vm1014_vm5, %v2016_v0, 0 }
 0xbf0   : > { %v1952_v5 = vsel %vm832_vm3, %v1946_v4, -inf  ;;  %2559 = vmatpush3.bf16.msra.mxu0 %v2021_v16 }
 0xbf1   : > { %1953 = vmax.xlane.f32.xlu1 %v1952_v5  ;;  %v2550_v6 = vpop.f32.mrf.mxu0 }
 0xbf3   : > { %v1949_v7 = vpop.f32.mrf.mxu0 }
 0xbf5   : > { %v2551_v8 = vpop.f32.mrf.mxu0 }
 0xc7a   : > { %v1954_v9 = vpop.xlane.xlu1 %1953 }
 0xc7b   : > { %v1955_v10 = vsub.f32 %v1946_v4, %v1954_v9 }
 0xc7d   : > { %v1956_v11 = vmul.f32 1.442695, %v1955_v10 }
 0xc7f   : > { %2746 = vpow2.f32 %v1956_v11 }
 0xc8c   : > { %v2747_v12 = vpop.eup %2746 }
 0xc8d   : > { %v1958_v13 = vsel %vm832_vm3, %v2747_v12, 0.0  ;;  %v1961_v14 = vpack.c.bf16 %v2747_v12, %v2747_v12 }
 0xc8e   : > { %1959 = vadd.xlane.f32.xlu1 %v1958_v13 }
 0xc8f   : > { %2555 = vmatmul.mubr.msk.bf16.vlgmr.msra.gmra.mxu1 %vm832_vm3, %v1961_v14 }
 0xcac   : > { %v1895_v17 = vpop.f32.mrf.mxu1 }
 0xcad   : > { %v1901_v18 = vadd.f32 %v1895_v17, %v1743_v52 }
 0xcae   : > { %v2544_v19 = vpop.f32.mrf.mxu1 }
 0xcb0   : > { %v1898_v20 = vpop.f32.mrf.mxu1 }
 0xcb2   : > { %v2545_v22 = vpop.f32.mrf.mxu1 }
 0xd17   : > { %v1960_v23 = vpop.xlane.xlu1 %1959 }
 0xd18   : > { %2748 = vrcp.f32 %v1960_v23 }
 0xd25   : > { %v2749_v25 = vpop.eup %2748 }
 0xd4f   : > { %v2004_v26 = vpop.f32.mrf.mxu1 }
 0xd50   : > { %v2011_v27 = vmul.f32 %v2749_v25, %v2004_v26 }
 0xd51   : > { %v2556_v29 = vpop.f32.mrf.mxu1 }
 0xd52   : > { %v2012_v30 = vpack.c.bf16 %v2011_v27, %v2011_v27 }
 0xd53   : > { %v2007_v31 = vpop.f32.mrf.mxu1 }
 0xd54   : > { %2561 = vmatmul.mubr.msk.bf16.vlgmr.msra.gmra.mxu0 %vm785_vm2, %v2012_v30 }
 0xd55   : > { %v2557_v21 = vpop.f32.mrf.mxu1 }
 0xe14   : > { %v2057_v33 = vpop.f32.mrf.mxu0 }
 0xe15   : > { %v2063_v24 = vadd.f32 %v2057_v33, %v1901_v18 }
 0xe16   : > { %v2562_v34 = vpop.f32.mrf.mxu0 }
 0xe17   : > { %v2070_v35 = vadd.f32 %v2334_v28, %v2063_v24 }
 0xe18   : > { %v2060_v36 = vpop.f32.mrf.mxu0 }
 0xe19   : > { %2071 = vst.msk [vmem:[%s570_s12] sm:$0xff] %vm616_vm1, %v2070_v35 }
 0xe1a   : > { %v2563_v37 = vpop.f32.mrf.mxu0 }
 0xe1b   : > { %3003 = shalt.err (!%p3000_p11)
}
 0xe1c   : > { %s3004_s3 = scalar_lea.hbm %s3619_s25, 128  ;;  %s3008_s11 = scalar_lea.hbm %s3733_s14, 256 }
 0xe1d   : > { %p3005_p3 = scmp.ne.s32.totalorder %s3619_s25, %s3004_s3  ;;  %p3009_p4 = scmp.lt.s32.totalorder %s3619_s25, %s3733_s14 }
 0xe1e   : > { %p3010_p8 = scmp.lt.s32.totalorder %s3008_s11, %s3004_s3 }
 0xe1f   : > { %p3006_p5 = pnand %p3005_p3, %p3734_p12 }
 0xe20   : > { %p3011_p9 = por %p3010_p8, %p3009_p4 }
 0xe21   : > { %p3007_p0 = pneg %p3006_p5 }
 0xe23   : > { %p3012_p1 = pnand %p3011_p9, %p3007_p0 }
 0xe25   : > { %3015 = shalt.err (!%p3012_p1)
}
 0xe26   : > { %2594 = dma.vmem_to_hbm [thread:$0]  (%p3734_p12), %s3621_s29, 128, %s3619_s25, %s2073_s20  }
 0xe27 PF: > { %s3735_s21 = sld [smem:[#allocation24_spill]] }
 0xe28   : > { %s3736_s24 = sld [smem:[#allocation30_spill]] }
 0xe29   : > { %s3737_s23 = sld [smem:[#allocation26_spill]] }
 0xe2d   : > { %s2099_s12 = sand.u32 1, %s3735_s21  }
 0xe2e   : > { %p3738_p10 = scmp.ne.s32.totalorder %s3736_s24, 0  ;;  %s2100_s13 = scalar_lea.sflag [#allocation4], %s2099_s12 }
 0xe2f   : > { %p3739_p7 = scmp.ge.s32.totalorder %s3737_s23, 2 }
 0xe31   : > { %p2626_p13 = pnand %p3739_p7, %p3738_p10 }
 0xe33   : > { %p2627_p6 = pneg %p2626_p13 }
 0xe35   : > { %3061 = dma.done.wait (%p2627_p6), %s2100_s13, 128  }
 0xe36   : > { %3063 = vsyncadd (%p2627_p6), %s2100_s13, 4294967168  ;;  %s33_s22 = sadd.s32 1, %s3737_s23   ;;  %s3740_s27 = sld [smem:[#allocation29_spill]] }
 0xe37   : > { %p30_p2 = scmp.ge.s32.totalorder %s33_s22, 4   ;;  %s3741_s20 = sld [smem:[#allocation25_spill]] }
 0xe38   : > { %s3742_s21 = sld [smem:[#allocation27_spill]]  ;;  %s3743_s17 = smov %s3070_s18 }
 0xe39   : > { %s3744_s18 = smov %s3074_s19  ;;  %32 = sbr.rel (!%p30_p2) target bundleno = 16 (0x10), region = 157 }
 0xe3c   : > { %s3745_s19 = smov %s3740_s27 }
 0xe3e   :  { %2105 = vsyncpa [#allocation3], 1 }
 0xe3f   :  { %2107 = vsyncpa [#allocation3 + $0x1], 1 }
 0xe40   :  { %2108 = vsyncpa [#allocation6], 1 }
 0xe41   :  { %2110 = vsyncpa [#allocation6 + $0x1], 1 }
 0xe42   :  { %2111 = vsyncpa [#allocation9], 1 }
 0xe43   :  { %2112 = vsyncpa [#allocation12], 1 }
 0xe44   :  { %2113 = vsyncpa [#allocation15], 1 }
 0xe45   :  { %2114 = vsyncpa [#allocation4], 1 }
 0xe46   :  { %2116 = vsyncpa [#allocation4 + $0x1], 1 }

</bundles_post_ra>
